<compile_context>
chip_gen: v6e
topology: v6e:2x2x1
jax: 0.10.0
libtpu: 0.0.40
codegen_flags: <defaults>
</compile_context>

<pallas_src>
import jax
import jax.numpy as jnp
from jax import lax
from jax.experimental import pallas as pl
from jax.experimental.pallas import tpu as pltpu

# ----------------------------- configuration ------------------------------
B = 2            # batch
C_IN = 3         # image channels
H = W = 16       # image spatial
PH = PW = 4      # patch size
GH, GW = H // PH, W // PW
N = GH * GW      # number of patches per image (16)
P = C_IN * PH * PW   # flattened patch dim (48)
D = 32           # embed dim
K = 8            # num_landmarks
KP1 = K + 1      # landmarks + background
NUM_CLASSES = 200
NCP = 256        # classes padded to a lane-dense multiple of 128
TEMP = 1.0       # softmax_temperature
LN_EPS = 1e-6

# packed weight slabs (see pack_params)
WA_ROWS = P + 2 * D          # 112: rows 0:P = [w_emb1|w_emb2], rows P: = stage-2 proj
SMALL_ROWS = 48              # rows 0:8 = vectors, rows 8:8+D = w_part (lane padded)
WCLS_ROWS = 2 * D + 8        # 72 : rows 0:2D = [w_cls1;w_head], rows 2D..2D+1 = biases

# packed "maps" output: one lane-dense [MAPS_ROWS, 128] slab per image,
# patch-major.  Per-patch rows (0..N-1): lanes 0:KP1 = part attention,
# lanes 16,17 = soft fg/bg, lanes 18,19 = hard fg/bg.
MAPS_LANES = 128
MAPS_ROWS = 32
ROW_MOD = N                  # rows N..N+KP1-1 : modulated part features (lanes 0:D)
ROW_PLOG = N + KP1           # row N+KP1      : part presence logits (lanes 0:KP1)
COL_SOFT = 16
COL_HARD = 18


# ------------------------------ fused kernel ------------------------------
def fused_kernel(patches_ref, wa_ref, small_ref, wcls_ref, maps_ref, preds_ref):
    f32 = jnp.float32

    patches = patches_ref[...]                        # [B*N, P]
    w_emb = wa_ref[0:P, :]                            # [P, 2D]   (w_emb1 | w_emb2)
    w_s2 = wa_ref[P:P + 2 * D, :]                     # [2D, 2D]  (rows D:2D = wv|wscore|0)
    vecs = small_ref[0:8, :]                          # [8, D]
    w_part = small_ref[8:8 + D, :]                    # [D, D]    (lanes 0:KP1 real)
    w_cls = wcls_ref[0:2 * D, :]                      # [2D, NCP] (rows 0:D=W_cls1, D:2D=W_head)
    b_cls = wcls_ref[2 * D:2 * D + 2, :]              # [2, NCP]  (b_cls1 ; b_head)

    b_emb = jnp.concatenate([vecs[0:1], vecs[1:2]], axis=-1)     # [1, 2D]
    gamma1, beta1 = vecs[2:3], vecs[3:4]
    gamma2, beta2 = vecs[4:5], vecs[5:6]
    b_part = vecs[6:7, 0:KP1]                                    # [1, KP1]

    # (1) one fused patch-embedding matmul for both stages.
    feats_both = jnp.dot(patches, w_emb,
                         preferred_element_type=f32) + b_emb     # [B*N, 2D]
    feats1 = feats_both[:, 0:D]                                  # stage-1 features

    # (2) stage-1 part logits + softmax over parts (per patch).
    logits = jnp.dot(feats1, w_part,
                     preferred_element_type=f32)[:, 0:KP1] + b_part   # [B*N, KP1]
    lt = logits * (1.0 / TEMP)
    mx = jnp.max(lt, axis=-1, keepdims=True)
    ex = jnp.exp(lt - mx)
    attn = ex * pl.reciprocal(jnp.sum(ex, axis=-1, keepdims=True),
                              approx=True)                       # [B*N, KP1]

    # (3) stage-2 value projection AND pre-scaled attention scores in ONE matmul
    #     (wscore = Wk @ (cls Wq)^T / sqrt(D) precomputed in the wrapper; the
    #     zero-padded top D rows of w_s2 select the stage-2 half of feats_both).
    s2 = jnp.dot(feats_both, w_s2, preferred_element_type=f32)   # [B*N, 2D]
    vv = s2[:, 0:D]                                              # stage-2 values
    scores = s2[:, D:D + 1]                                      # (q . k_n) / sqrt(D)

    cls_rows = []
    for b in range(B):                                           # B = 2, unrolled
        lo, hi = b * N, (b + 1) * N
        attn_b = attn[lo:hi, :]
        feats1_b = feats1[lo:hi, :]
        vv_b = vv[lo:hi, :]
        logits_b = logits[lo:hi, :]
        scores_b = scores[lo:hi, :]

        # soft / hard fg-bg per patch (argmax with ties -> fg, index 0).
        fg_soft = jnp.max(attn_b[:, 0:K], axis=-1, keepdims=True)   # [N, 1]
        bg_soft = attn_b[:, K:KP1]                                   # [N, 1]
        hard_fg = (fg_soft >= bg_soft).astype(f32)
        hard_bg = 1.0 - hard_fg

        # attention-weighted part pooling: normalize per part, then one matmul.
        part_sum = jnp.sum(attn_b, axis=0, keepdims=True)            # [1, KP1]
        attn_norm = attn_b * pl.reciprocal(part_sum + 1e-6, approx=True)
        part_feats = lax.dot_general(attn_norm, feats1_b,
                                     (((0,), (0,)), ((), ())),
                                     preferred_element_type=f32)     # [KP1, D]

        # layer-norm modulation.
        mu1 = jnp.mean(part_feats, axis=-1, keepdims=True)
        var1 = jnp.mean((part_feats - mu1) ** 2, axis=-1, keepdims=True)
        mod = (part_feats - mu1) * lax.rsqrt(var1 + LN_EPS)
        mod = mod * gamma1 + beta1                                   # [KP1, D]
        mean_mod = jnp.mean(mod[0:K, :], axis=0, keepdims=True)      # [1, D]

        # part presence logits (max over patches).
        plog = jnp.max(logits_b, axis=0, keepdims=True)              # [1, KP1]

        # stage-2: masked attention pooling over foreground patches.
        # TODO(synk): if every patch is background the softmax degrades to a
        # uniform distribution over all patches (same behaviour as before).
        masked = jnp.where(hard_fg > 0.5, scores_b, -1e30)           # [N, 1]
        sm = jnp.max(masked, axis=0, keepdims=True)
        se = jnp.exp(masked - sm)
        attn2 = se * pl.reciprocal(jnp.sum(se, axis=0, keepdims=True),
                                   approx=True)                      # [N, 1]
        pooled = lax.dot_general(attn2, vv_b, (((0,), (0,)), ((), ())),
                                 preferred_element_type=f32)         # [1, D]
        mu2 = jnp.mean(pooled, axis=-1, keepdims=True)
        var2 = jnp.mean((pooled - mu2) ** 2, axis=-1, keepdims=True)
        hvec = (pooled - mu2) * lax.rsqrt(var2 + LN_EPS)
        hvec = hvec * gamma2 + beta2                                 # [1, D]

        # fused classifier rows: [mean_mod | 0] -> stage-1 head, [0 | hvec] -> stage-2 head.
        zero_d = jnp.zeros((1, D), f32)
        cls_rows.append(jnp.concatenate([mean_mod, zero_d], axis=-1))
        cls_rows.append(jnp.concatenate([zero_d, hvec], axis=-1))

        # assemble this image's lane-dense maps slab in registers -> ONE store.
        per_patch = jnp.concatenate([
            attn_b,                                              # lanes 0:KP1
            jnp.zeros((N, COL_SOFT - KP1), f32),                 # lanes KP1:16
            fg_soft, bg_soft, hard_fg, hard_bg,                  # lanes 16:20
            jnp.zeros((N, MAPS_LANES - (COL_HARD + 2)), f32),
        ], axis=-1)                                              # [N, 128]
        mod_pad = jnp.concatenate(
            [mod, jnp.zeros((KP1, MAPS_LANES - D), f32)], axis=-1)        # [KP1, 128]
        plog_pad = jnp.concatenate(
            [plog, jnp.zeros((1, MAPS_LANES - KP1), f32)], axis=-1)       # [1, 128]
        block = jnp.concatenate(
            [per_patch, mod_pad, plog_pad,
             jnp.zeros((MAPS_ROWS - (N + KP1 + 1), MAPS_LANES), f32)],
            axis=0)                                                       # [32, 128]
        maps_ref[b] = block

    # both prediction heads for the whole batch: one [2B,2D] x [2D,NCP] matmul.
    cls_in = jnp.concatenate(cls_rows, axis=0)                   # [2B, 2D]
    bias = jnp.concatenate([b_cls] * B, axis=0)                  # [2B, NCP]
    preds_ref[...] = jnp.dot(cls_in, w_cls, preferred_element_type=f32) + bias


# ------------------------------ pallas wrapper -----------------------------
def run_fused(patches, WA, SMALL, WCLS):
    return pl.pallas_call(
        fused_kernel,
        grid=(1,),
        in_specs=[
            pl.BlockSpec((B * N, P), lambda i: (0, 0)),
            pl.BlockSpec((WA_ROWS, 2 * D), lambda i: (0, 0)),
            pl.BlockSpec((SMALL_ROWS, D), lambda i: (0, 0)),
            pl.BlockSpec((WCLS_ROWS, NCP), lambda i: (0, 0)),
        ],
        out_specs=[
            pl.BlockSpec((B, MAPS_ROWS, MAPS_LANES), lambda i: (0, 0, 0)),
            pl.BlockSpec((2 * B, NCP), lambda i: (0, 0)),
        ],
        out_shape=[
            jax.ShapeDtypeStruct((B, MAPS_ROWS, MAPS_LANES), jnp.float32),
            jax.ShapeDtypeStruct((2 * B, NCP), jnp.float32),
        ],
        compiler_params=pltpu.CompilerParams(dimension_semantics=("arbitrary",)),
    )(patches, WA, SMALL, WCLS)


# --------------------------- parameter packing -----------------------------
def pack_params(params):
    f32 = jnp.float32
    # stage-2 query is image independent: fold (cls_tok @ Wq) / sqrt(D) through
    # Wk so the per-patch score is one extra output column of the s2 matmul.
    q = jnp.dot(params["cls_tok"], params["wq"])                          # [1, D]
    wscore = jnp.dot(params["wk"], q.T) * (1.0 / (D ** 0.5))              # [D, 1]

    w_emb = jnp.concatenate([params["w_emb1"], params["w_emb2"]], axis=1)         # [P, 2D]
    s2_cols = jnp.concatenate(
        [params["wv"], wscore, jnp.zeros((D, 2 * D - (D + 1)), f32)], axis=1)     # [D, 2D]
    w_s2 = jnp.concatenate([jnp.zeros((D, 2 * D), f32), s2_cols], axis=0)         # [2D, 2D]
    WA = jnp.concatenate([w_emb, w_s2], axis=0)                                   # [112, 2D]

    vecs = jnp.concatenate([
        params["b_emb1"], params["b_emb2"],
        params["gamma1"], params["beta1"],
        params["gamma2"], params["beta2"],
        jnp.pad(params["b_part"], ((0, 0), (0, D - KP1))),
        jnp.zeros((1, D), f32),
    ], axis=0)                                                                    # [8, D]
    w_part = jnp.pad(params["w_part"], ((0, 0), (0, D - KP1)))                    # [D, D]
    SMALL = jnp.concatenate(
        [vecs, w_part, jnp.zeros((SMALL_ROWS - 8 - D, D), f32)], axis=0)          # [48, D]

    wc = jnp.concatenate([params["w_cls1"], params["w_head"]], axis=0)            # [2D, 200]
    bc = jnp.concatenate([params["b_cls1"], params["b_head"]], axis=0)            # [2, 200]
    wcls = jnp.concatenate(
        [wc, bc, jnp.zeros((WCLS_ROWS - 2 * D - 2, NUM_CLASSES), f32)], axis=0)   # [72, 200]
    WCLS = jnp.pad(wcls, ((0, 0), (0, NCP - NUM_CLASSES)))                        # [72, 256]
    return WA, SMALL, WCLS


# ------------------------------ model glue --------------------------------
def extract_patches(x):
    # x: [B, C, H, W] -> [B, N, C*PH*PW] with n = gh*GW + gw
    xb = x.reshape(B, C_IN, GH, PH, GW, PW)
    xb = xb.transpose(0, 2, 4, 1, 3, 5)           # [B, GH, GW, C, PH, PW]
    return xb.reshape(B, N, P)


def init_params(key):
    ks = jax.random.split(key, 12)
    s = 0.02
    return {
        "w_emb1": jax.random.normal(ks[0], (P, D), jnp.float32) * s,
        "b_emb1": jnp.zeros((1, D), jnp.float32),
        "w_part": jax.random.normal(ks[1], (D, KP1), jnp.float32) * s,
        "b_part": jnp.zeros((1, KP1), jnp.float32),
        "gamma1": jnp.ones((1, D), jnp.float32),
        "beta1": jnp.zeros((1, D), jnp.float32),
        "w_cls1": jax.random.normal(ks[2], (D, NUM_CLASSES), jnp.float32) * s,
        "b_cls1": jnp.zeros((1, NUM_CLASSES), jnp.float32),
        "w_emb2": jax.random.normal(ks[3], (P, D), jnp.float32) * s,
        "b_emb2": jnp.zeros((1, D), jnp.float32),
        "cls_tok": jax.random.normal(ks[4], (1, D), jnp.float32) * s,
        "wq": jax.random.normal(ks[5], (D, D), jnp.float32) * s,
        "wk": jax.random.normal(ks[6], (D, D), jnp.float32) * s,
        "wv": jax.random.normal(ks[7], (D, D), jnp.float32) * s,
        "gamma2": jnp.ones((1, D), jnp.float32),
        "beta2": jnp.zeros((1, D), jnp.float32),
        "w_head": jax.random.normal(ks[8], (D, NUM_CLASSES), jnp.float32) * s,
        "b_head": jnp.zeros((1, NUM_CLASSES), jnp.float32),
    }


@jax.jit
def full_two_stage_forward(x, params):
    """Eval-mode forward of FullTwoStageModelDoubleClassify (no part removal)."""
    patches = extract_patches(x.astype(jnp.float32)).reshape(B * N, P)
    WA, SMALL, WCLS = pack_params(params)
    maps, preds = run_fused(patches, WA, SMALL, WCLS)

    # maps slab is patch-major & lane-dense; the tiny transposes stay in XLA.
    attn_maps_combined = jnp.transpose(
        maps[:, :N, 0:KP1], (0, 2, 1)).reshape(B, KP1, GH, GW)
    attn_maps_fg_bg_soft = jnp.transpose(
        maps[:, :N, COL_SOFT:COL_SOFT + 2], (0, 2, 1)).reshape(B, 2, GH, GW)
    attn_maps_fg_bg = jnp.transpose(
        maps[:, :N, COL_HARD:COL_HARD + 2], (0, 2, 1)).reshape(B, 2, GH, GW)
    all_features_mod = maps[:, ROW_MOD:ROW_MOD + KP1, 0:D]       # [B, K+1, D]
    part_logits = maps[:, ROW_PLOG, 0:KP1]                       # [B, K+1]

    preds_r = preds[:, :NUM_CLASSES].reshape(B, 2, NUM_CLASSES)
    pred_stage_1 = preds_r[:, 0, :]
    pred_stage_2 = preds_r[:, 1, :]

    return (pred_stage_2, attn_maps_combined,
            (attn_maps_fg_bg, attn_maps_fg_bg_soft),
            all_features_mod, pred_stage_1, part_logits)


# ---------------------------------- main -----------------------------------
if __name__ == "__main__":
    key = jax.random.PRNGKey(0)
    kx, kp = jax.random.split(key)
    x = jax.random.normal(kx, (B, C_IN, H, W), jnp.float32)
    params = init_params(kp)

    out = jax.block_until_ready(full_two_stage_forward(x, params))

    pred2, attn_maps, (fg_bg, fg_bg_soft), feats_mod, pred1, plog = out
    assert pred2.shape == (B, NUM_CLASSES)
    assert attn_maps.shape == (B, KP1, GH, GW)
    assert fg_bg.shape == (B, 2, GH, GW) and fg_bg_soft.shape == (B, 2, GH, GW)
    assert feats_mod.shape == (B, KP1, D)
    assert pred1.shape == (B, NUM_CLASSES)
    assert plog.shape == (B, KP1)
    # hard fg/bg maps must be one-hot
    assert bool(jnp.all(jnp.abs(fg_bg.sum(axis=1) - 1.0) < 1e-6))
    assert bool(jnp.all(jnp.isfinite(pred1))) and bool(jnp.all(jnp.isfinite(pred2)))
    print("KERNEL_OK")
</pallas_src>

<mosaic_0001>
module attributes {stable_mosaic.version = 11 : i64} {
  func.func @fused_kernel(%arg0: i32, %arg1: memref<32x48xf32, #tpu.memory_space<vmem>>, %arg2: memref<112x64xf32, #tpu.memory_space<vmem>>, %arg3: memref<48x32xf32, #tpu.memory_space<vmem>>, %arg4: memref<72x256xf32, #tpu.memory_space<vmem>>, %arg5: memref<2x32x128xf32, #tpu.memory_space<vmem>>, %arg6: memref<4x256xf32, #tpu.memory_space<vmem>>) attributes {dimension_semantics = [#tpu.dimension_semantics<arbitrary>], iteration_bounds = array<i64: 1>, scalar_prefetch = 0 : i64, scratch_operands = 0 : i64, tpu.core_type = #tpu.core_type<tc>, window_params = [{pipeline_mode = #tpu.pipeline_mode<synchronous>, transform_indices = @transform_0, window_bounds = array<i64: 32, 48>}, {pipeline_mode = #tpu.pipeline_mode<synchronous>, transform_indices = @transform_1, window_bounds = array<i64: 112, 64>}, {pipeline_mode = #tpu.pipeline_mode<synchronous>, transform_indices = @transform_2, window_bounds = array<i64: 48, 32>}, {pipeline_mode = #tpu.pipeline_mode<synchronous>, transform_indices = @transform_3, window_bounds = array<i64: 72, 256>}, {pipeline_mode = #tpu.pipeline_mode<synchronous>, transform_indices = @transform_4, window_bounds = array<i64: 2, 32, 128>}, {pipeline_mode = #tpu.pipeline_mode<synchronous>, transform_indices = @transform_5, window_bounds = array<i64: 4, 256>}]} {
    %c0 = arith.constant 0 : index
    %c0_0 = arith.constant 0 : index
    %0 = vector.load %arg1[%c0, %c0_0] : memref<32x48xf32, #tpu.memory_space<vmem>>, vector<32x48xf32>
    %c0_1 = arith.constant 0 : index
    %c0_2 = arith.constant 0 : index
    %1 = vector.load %arg2[%c0_1, %c0_2] : memref<112x64xf32, #tpu.memory_space<vmem>>, vector<48x64xf32>
    %c48 = arith.constant 48 : index
    %c0_3 = arith.constant 0 : index
    %2 = vector.load %arg2[%c48, %c0_3] : memref<112x64xf32, #tpu.memory_space<vmem>>, vector<64x64xf32>
    %c0_4 = arith.constant 0 : index
    %c0_5 = arith.constant 0 : index
    %3 = vector.load %arg3[%c0_4, %c0_5] : memref<48x32xf32, #tpu.memory_space<vmem>>, vector<8x32xf32>
    %c8 = arith.constant 8 : index
    %c0_6 = arith.constant 0 : index
    %4 = vector.load %arg3[%c8, %c0_6] : memref<48x32xf32, #tpu.memory_space<vmem>>, vector<32x32xf32>
    %c0_7 = arith.constant 0 : index
    %c0_8 = arith.constant 0 : index
    %5 = vector.load %arg4[%c0_7, %c0_8] : memref<72x256xf32, #tpu.memory_space<vmem>>, vector<64x256xf32>
    %c64 = arith.constant 64 : index
    %c0_9 = arith.constant 0 : index
    %6 = vector.load %arg4[%c64, %c0_9] : memref<72x256xf32, #tpu.memory_space<vmem>>, vector<2x256xf32>
    %7 = vector.extract_strided_slice %3 {offsets = [0, 0], sizes = [1, 32], strides = [1, 1]} : vector<8x32xf32> to vector<1x32xf32>
    %8 = vector.extract_strided_slice %3 {offsets = [1, 0], sizes = [1, 32], strides = [1, 1]} : vector<8x32xf32> to vector<1x32xf32>
    %9 = tpu.concatenate %7, %8 in 1 : vector<1x32xf32>, vector<1x32xf32> -> vector<1x64xf32>
    %10 = vector.extract_strided_slice %3 {offsets = [2, 0], sizes = [1, 32], strides = [1, 1]} : vector<8x32xf32> to vector<1x32xf32>
    %11 = vector.extract_strided_slice %3 {offsets = [3, 0], sizes = [1, 32], strides = [1, 1]} : vector<8x32xf32> to vector<1x32xf32>
    %12 = vector.extract_strided_slice %3 {offsets = [4, 0], sizes = [1, 32], strides = [1, 1]} : vector<8x32xf32> to vector<1x32xf32>
    %13 = vector.extract_strided_slice %3 {offsets = [5, 0], sizes = [1, 32], strides = [1, 1]} : vector<8x32xf32> to vector<1x32xf32>
    %14 = vector.extract_strided_slice %3 {offsets = [6, 0], sizes = [1, 9], strides = [1, 1]} : vector<8x32xf32> to vector<1x9xf32>
    %cst = arith.constant dense<0.000000e+00> : vector<32x64xf32>
    %15 = tpu.matmul %0, %1, %cst {dimension_numbers = #tpu.dot_dimension_numbers<[1], [0], [0], [1], [0, 0, 1, 1], [], []>} : vector<32x48xf32>, vector<48x64xf32>, vector<32x64xf32> -> vector<32x64xf32>
    %16 = vector.broadcast %9 : vector<1x64xf32> to vector<32x64xf32>
    %17 = arith.addf %15, %16 : vector<32x64xf32>
    %18 = vector.extract_strided_slice %17 {offsets = [0, 0], sizes = [32, 32], strides = [1, 1]} : vector<32x64xf32> to vector<32x32xf32>
    %cst_10 = arith.constant dense<0.000000e+00> : vector<32x32xf32>
    %19 = tpu.matmul %18, %4, %cst_10 {dimension_numbers = #tpu.dot_dimension_numbers<[1], [0], [0], [1], [0, 0, 1, 1], [], []>} : vector<32x32xf32>, vector<32x32xf32>, vector<32x32xf32> -> vector<32x32xf32>
    %20 = vector.extract_strided_slice %19 {offsets = [0, 0], sizes = [32, 9], strides = [1, 1]} : vector<32x32xf32> to vector<32x9xf32>
    %21 = vector.broadcast %14 : vector<1x9xf32> to vector<32x9xf32>
    %22 = arith.addf %20, %21 : vector<32x9xf32>
    %cst_11 = arith.constant 1.000000e+00 : f32
    %23 = vector.broadcast %cst_11 : f32 to vector<32x9xf32>
    %24 = arith.mulf %22, %23 : vector<32x9xf32>
    %cst_12 = arith.constant dense<0xFF800000> : vector<32xf32>
    %25 = vector.multi_reduction <maximumf>, %24, %cst_12 [1] : vector<32x9xf32> to vector<32xf32>
    %26 = vector.shape_cast %25 : vector<32xf32> to vector<32x1xf32>
    %27 = vector.broadcast %26 : vector<32x1xf32> to vector<32x9xf32>
    %28 = arith.subf %24, %27 : vector<32x9xf32>
    %29 = math.exp %28 : vector<32x9xf32>
    %cst_13 = arith.constant dense<0.000000e+00> : vector<32xf32>
    %30 = vector.multi_reduction <add>, %29, %cst_13 [1] : vector<32x9xf32> to vector<32xf32>
    %31 = vector.shape_cast %30 : vector<32xf32> to vector<32x1xf32>
    %32 = tpu.reciprocal %31 {approx = true} : vector<32x1xf32> -> vector<32x1xf32>
    %33 = vector.broadcast %32 : vector<32x1xf32> to vector<32x9xf32>
    %34 = arith.mulf %29, %33 : vector<32x9xf32>
    %cst_14 = arith.constant dense<0.000000e+00> : vector<32x64xf32>
    %35 = tpu.matmul %17, %2, %cst_14 {dimension_numbers = #tpu.dot_dimension_numbers<[1], [0], [0], [1], [0, 0, 1, 1], [], []>} : vector<32x64xf32>, vector<64x64xf32>, vector<32x64xf32> -> vector<32x64xf32>
    %36 = vector.extract_strided_slice %35 {offsets = [0, 0], sizes = [32, 32], strides = [1, 1]} : vector<32x64xf32> to vector<32x32xf32>
    %37 = vector.extract_strided_slice %35 {offsets = [0, 32], sizes = [32, 1], strides = [1, 1]} : vector<32x64xf32> to vector<32x1xf32>
    %38 = vector.extract_strided_slice %34 {offsets = [0, 0], sizes = [16, 9], strides = [1, 1]} : vector<32x9xf32> to vector<16x9xf32>
    %39 = vector.extract_strided_slice %18 {offsets = [0, 0], sizes = [16, 32], strides = [1, 1]} : vector<32x32xf32> to vector<16x32xf32>
    %40 = vector.extract_strided_slice %36 {offsets = [0, 0], sizes = [16, 32], strides = [1, 1]} : vector<32x32xf32> to vector<16x32xf32>
    %41 = vector.extract_strided_slice %22 {offsets = [0, 0], sizes = [16, 9], strides = [1, 1]} : vector<32x9xf32> to vector<16x9xf32>
    %42 = vector.extract_strided_slice %37 {offsets = [0, 0], sizes = [16, 1], strides = [1, 1]} : vector<32x1xf32> to vector<16x1xf32>
    %43 = vector.extract_strided_slice %38 {offsets = [0, 0], sizes = [16, 8], strides = [1, 1]} : vector<16x9xf32> to vector<16x8xf32>
    %cst_15 = arith.constant dense<0xFF800000> : vector<16xf32>
    %44 = vector.multi_reduction <maximumf>, %43, %cst_15 [1] : vector<16x8xf32> to vector<16xf32>
    %45 = vector.shape_cast %44 : vector<16xf32> to vector<16x1xf32>
    %46 = vector.extract_strided_slice %38 {offsets = [0, 8], sizes = [16, 1], strides = [1, 1]} : vector<16x9xf32> to vector<16x1xf32>
    %47 = arith.cmpf oge, %45, %46 : vector<16x1xf32>
    %48 = arith.extui %47 : vector<16x1xi1> to vector<16x1xi32>
    %49 = arith.sitofp %48 : vector<16x1xi32> to vector<16x1xf32>
    %cst_16 = arith.constant 1.000000e+00 : f32
    %50 = vector.broadcast %cst_16 : f32 to vector<16x1xf32>
    %51 = arith.subf %50, %49 : vector<16x1xf32>
    %cst_17 = arith.constant dense<0.000000e+00> : vector<9xf32>
    %52 = vector.multi_reduction <add>, %38, %cst_17 [0] : vector<16x9xf32> to vector<9xf32>
    %53 = vector.shape_cast %52 : vector<9xf32> to vector<1x9xf32>
    %cst_18 = arith.constant 9.99999997E-7 : f32
    %54 = vector.broadcast %cst_18 : f32 to vector<1x9xf32>
    %55 = arith.addf %53, %54 : vector<1x9xf32>
    %56 = tpu.reciprocal %55 {approx = true} : vector<1x9xf32> -> vector<1x9xf32>
    %57 = vector.broadcast %56 : vector<1x9xf32> to vector<16x9xf32>
    %58 = arith.mulf %38, %57 : vector<16x9xf32>
    %cst_19 = arith.constant dense<0.000000e+00> : vector<9x32xf32>
    %59 = tpu.matmul %58, %39, %cst_19 {dimension_numbers = #tpu.dot_dimension_numbers<[0], [0], [1], [1], [0, 1, 1, 1], [], []>} : vector<16x9xf32>, vector<16x32xf32>, vector<9x32xf32> -> vector<9x32xf32>
    %cst_20 = arith.constant dense<0.000000e+00> : vector<9xf32>
    %60 = vector.multi_reduction <add>, %59, %cst_20 [1] : vector<9x32xf32> to vector<9xf32>
    %61 = vector.shape_cast %60 : vector<9xf32> to vector<9x1xf32>
    %cst_21 = arith.constant 3.200000e+01 : f32
    %62 = vector.broadcast %cst_21 : f32 to vector<9x1xf32>
    %63 = arith.divf %61, %62 : vector<9x1xf32>
    %64 = vector.broadcast %63 : vector<9x1xf32> to vector<9x32xf32>
    %65 = arith.subf %59, %64 : vector<9x32xf32>
    %66 = arith.mulf %65, %65 : vector<9x32xf32>
    %cst_22 = arith.constant dense<0.000000e+00> : vector<9xf32>
    %67 = vector.multi_reduction <add>, %66, %cst_22 [1] : vector<9x32xf32> to vector<9xf32>
    %68 = vector.shape_cast %67 : vector<9xf32> to vector<9x1xf32>
    %cst_23 = arith.constant 3.200000e+01 : f32
    %69 = vector.broadcast %cst_23 : f32 to vector<9x1xf32>
    %70 = arith.divf %68, %69 : vector<9x1xf32>
    %71 = vector.broadcast %63 : vector<9x1xf32> to vector<9x32xf32>
    %72 = arith.subf %59, %71 : vector<9x32xf32>
    %cst_24 = arith.constant 9.99999997E-7 : f32
    %73 = vector.broadcast %cst_24 : f32 to vector<9x1xf32>
    %74 = arith.addf %70, %73 : vector<9x1xf32>
    %75 = math.rsqrt %74 : vector<9x1xf32>
    %76 = vector.broadcast %75 : vector<9x1xf32> to vector<9x32xf32>
    %77 = arith.mulf %72, %76 : vector<9x32xf32>
    %78 = vector.broadcast %10 : vector<1x32xf32> to vector<9x32xf32>
    %79 = arith.mulf %77, %78 : vector<9x32xf32>
    %80 = vector.broadcast %11 : vector<1x32xf32> to vector<9x32xf32>
    %81 = arith.addf %79, %80 : vector<9x32xf32>
    %82 = vector.extract_strided_slice %81 {offsets = [0, 0], sizes = [8, 32], strides = [1, 1]} : vector<9x32xf32> to vector<8x32xf32>
    %cst_25 = arith.constant dense<0.000000e+00> : vector<32xf32>
    %83 = vector.multi_reduction <add>, %82, %cst_25 [0] : vector<8x32xf32> to vector<32xf32>
    %84 = vector.shape_cast %83 : vector<32xf32> to vector<1x32xf32>
    %cst_26 = arith.constant 8.000000e+00 : f32
    %85 = vector.broadcast %cst_26 : f32 to vector<1x32xf32>
    %86 = arith.divf %84, %85 : vector<1x32xf32>
    %cst_27 = arith.constant dense<0xFF800000> : vector<9xf32>
    %87 = vector.multi_reduction <maximumf>, %41, %cst_27 [0] : vector<16x9xf32> to vector<9xf32>
    %88 = vector.shape_cast %87 : vector<9xf32> to vector<1x9xf32>
    %cst_28 = arith.constant 5.000000e-01 : f32
    %89 = vector.broadcast %cst_28 : f32 to vector<16x1xf32>
    %90 = arith.cmpf ogt, %49, %89 : vector<16x1xf32>
    %cst_29 = arith.constant -1.000000e+30 : f32
    %91 = vector.broadcast %cst_29 : f32 to vector<16x1xf32>
    %92 = arith.select %90, %42, %91 : vector<16x1xi1>, vector<16x1xf32>
    %cst_30 = arith.constant dense<0xFF800000> : vector<1xf32>
    %93 = vector.multi_reduction <maximumf>, %92, %cst_30 [0] : vector<16x1xf32> to vector<1xf32>
    %94 = vector.shape_cast %93 : vector<1xf32> to vector<1x1xf32>
    %95 = vector.broadcast %94 : vector<1x1xf32> to vector<16x1xf32>
    %96 = arith.subf %92, %95 : vector<16x1xf32>
    %97 = math.exp %96 : vector<16x1xf32>
    %cst_31 = arith.constant dense<0.000000e+00> : vector<1xf32>
    %98 = vector.multi_reduction <add>, %97, %cst_31 [0] : vector<16x1xf32> to vector<1xf32>
    %99 = vector.shape_cast %98 : vector<1xf32> to vector<1x1xf32>
    %100 = tpu.reciprocal %99 {approx = true} : vector<1x1xf32> -> vector<1x1xf32>
    %101 = vector.broadcast %100 : vector<1x1xf32> to vector<16x1xf32>
    %102 = arith.mulf %97, %101 : vector<16x1xf32>
    %cst_32 = arith.constant dense<0.000000e+00> : vector<1x32xf32>
    %103 = tpu.matmul %102, %40, %cst_32 {dimension_numbers = #tpu.dot_dimension_numbers<[0], [0], [1], [1], [0, 1, 1, 1], [], []>} : vector<16x1xf32>, vector<16x32xf32>, vector<1x32xf32> -> vector<1x32xf32>
    %cst_33 = arith.constant dense<0.000000e+00> : vector<1xf32>
    %104 = vector.multi_reduction <add>, %103, %cst_33 [1] : vector<1x32xf32> to vector<1xf32>
    %105 = vector.shape_cast %104 : vector<1xf32> to vector<1x1xf32>
    %cst_34 = arith.constant 3.200000e+01 : f32
    %106 = vector.broadcast %cst_34 : f32 to vector<1x1xf32>
    %107 = arith.divf %105, %106 : vector<1x1xf32>
    %108 = vector.broadcast %107 : vector<1x1xf32> to vector<1x32xf32>
    %109 = arith.subf %103, %108 : vector<1x32xf32>
    %110 = arith.mulf %109, %109 : vector<1x32xf32>
    %cst_35 = arith.constant dense<0.000000e+00> : vector<1xf32>
    %111 = vector.multi_reduction <add>, %110, %cst_35 [1] : vector<1x32xf32> to vector<1xf32>
    %112 = vector.shape_cast %111 : vector<1xf32> to vector<1x1xf32>
    %cst_36 = arith.constant 3.200000e+01 : f32
    %113 = vector.broadcast %cst_36 : f32 to vector<1x1xf32>
    %114 = arith.divf %112, %113 : vector<1x1xf32>
    %115 = vector.broadcast %107 : vector<1x1xf32> to vector<1x32xf32>
    %116 = arith.subf %103, %115 : vector<1x32xf32>
    %cst_37 = arith.constant 9.99999997E-7 : f32
    %117 = vector.broadcast %cst_37 : f32 to vector<1x1xf32>
    %118 = arith.addf %114, %117 : vector<1x1xf32>
    %119 = math.rsqrt %118 : vector<1x1xf32>
    %120 = vector.broadcast %119 : vector<1x1xf32> to vector<1x32xf32>
    %121 = arith.mulf %116, %120 : vector<1x32xf32>
    %122 = arith.mulf %121, %12 : vector<1x32xf32>
    %123 = arith.addf %122, %13 : vector<1x32xf32>
    %cst_38 = arith.constant 0.000000e+00 : f32
    %124 = vector.broadcast %cst_38 : f32 to vector<1x32xf32>
    %125 = tpu.concatenate %86, %124 in 1 : vector<1x32xf32>, vector<1x32xf32> -> vector<1x64xf32>
    %126 = tpu.concatenate %124, %123 in 1 : vector<1x32xf32>, vector<1x32xf32> -> vector<1x64xf32>
    %cst_39 = arith.constant 0.000000e+00 : f32
    %127 = vector.broadcast %cst_39 : f32 to vector<16x7xf32>
    %cst_40 = arith.constant 0.000000e+00 : f32
    %128 = vector.broadcast %cst_40 : f32 to vector<16x108xf32>
    %129 = tpu.concatenate %38, %127, %45, %46, %49, %51, %128 in 1 : vector<16x9xf32>, vector<16x7xf32>, vector<16x1xf32>, vector<16x1xf32>, vector<16x1xf32>, vector<16x1xf32>, vector<16x108xf32> -> vector<16x128xf32>
    %cst_41 = arith.constant 0.000000e+00 : f32
    %130 = vector.broadcast %cst_41 : f32 to vector<9x96xf32>
    %131 = tpu.concatenate %81, %130 in 1 : vector<9x32xf32>, vector<9x96xf32> -> vector<9x128xf32>
    %cst_42 = arith.constant 0.000000e+00 : f32
    %132 = vector.broadcast %cst_42 : f32 to vector<1x119xf32>
    %133 = tpu.concatenate %88, %132 in 1 : vector<1x9xf32>, vector<1x119xf32> -> vector<1x128xf32>
    %cst_43 = arith.constant 0.000000e+00 : f32
    %134 = vector.broadcast %cst_43 : f32 to vector<6x128xf32>
    %135 = tpu.concatenate %129, %131, %133, %134 in 0 : vector<16x128xf32>, vector<9x128xf32>, vector<1x128xf32>, vector<6x128xf32> -> vector<32x128xf32>
    %c0_44 = arith.constant 0 : index
    %c0_45 = arith.constant 0 : index
    %c0_46 = arith.constant 0 : index
    %136 = vector.load %arg5[%c0_44, %c0_45, %c0_46] : memref<2x32x128xf32, #tpu.memory_space<vmem>>, vector<1x32x128xf32>
    %137 = vector.shape_cast %136 : vector<1x32x128xf32> to vector<32x128xf32>
    %138 = vector.shape_cast %135 : vector<32x128xf32> to vector<1x32x128xf32>
    tpu.vector_store %arg5[%c0_44, %c0_45, %c0_46], %138 {strides = array<i32>} : memref<2x32x128xf32, #tpu.memory_space<vmem>>, vector<1x32x128xf32>,
    %139 = vector.extract_strided_slice %34 {offsets = [16, 0], sizes = [16, 9], strides = [1, 1]} : vector<32x9xf32> to vector<16x9xf32>
    %140 = vector.extract_strided_slice %18 {offsets = [16, 0], sizes = [16, 32], strides = [1, 1]} : vector<32x32xf32> to vector<16x32xf32>
    %141 = vector.extract_strided_slice %36 {offsets = [16, 0], sizes = [16, 32], strides = [1, 1]} : vector<32x32xf32> to vector<16x32xf32>
    %142 = vector.extract_strided_slice %22 {offsets = [16, 0], sizes = [16, 9], strides = [1, 1]} : vector<32x9xf32> to vector<16x9xf32>
    %143 = vector.extract_strided_slice %37 {offsets = [16, 0], sizes = [16, 1], strides = [1, 1]} : vector<32x1xf32> to vector<16x1xf32>
    %144 = vector.extract_strided_slice %139 {offsets = [0, 0], sizes = [16, 8], strides = [1, 1]} : vector<16x9xf32> to vector<16x8xf32>
    %cst_47 = arith.constant dense<0xFF800000> : vector<16xf32>
    %145 = vector.multi_reduction <maximumf>, %144, %cst_47 [1] : vector<16x8xf32> to vector<16xf32>
    %146 = vector.shape_cast %145 : vector<16xf32> to vector<16x1xf32>
    %147 = vector.extract_strided_slice %139 {offsets = [0, 8], sizes = [16, 1], strides = [1, 1]} : vector<16x9xf32> to vector<16x1xf32>
    %148 = arith.cmpf oge, %146, %147 : vector<16x1xf32>
    %149 = arith.extui %148 : vector<16x1xi1> to vector<16x1xi32>
    %150 = arith.sitofp %149 : vector<16x1xi32> to vector<16x1xf32>
    %cst_48 = arith.constant 1.000000e+00 : f32
    %151 = vector.broadcast %cst_48 : f32 to vector<16x1xf32>
    %152 = arith.subf %151, %150 : vector<16x1xf32>
    %cst_49 = arith.constant dense<0.000000e+00> : vector<9xf32>
    %153 = vector.multi_reduction <add>, %139, %cst_49 [0] : vector<16x9xf32> to vector<9xf32>
    %154 = vector.shape_cast %153 : vector<9xf32> to vector<1x9xf32>
    %cst_50 = arith.constant 9.99999997E-7 : f32
    %155 = vector.broadcast %cst_50 : f32 to vector<1x9xf32>
    %156 = arith.addf %154, %155 : vector<1x9xf32>
    %157 = tpu.reciprocal %156 {approx = true} : vector<1x9xf32> -> vector<1x9xf32>
    %158 = vector.broadcast %157 : vector<1x9xf32> to vector<16x9xf32>
    %159 = arith.mulf %139, %158 : vector<16x9xf32>
    %cst_51 = arith.constant dense<0.000000e+00> : vector<9x32xf32>
    %160 = tpu.matmul %159, %140, %cst_51 {dimension_numbers = #tpu.dot_dimension_numbers<[0], [0], [1], [1], [0, 1, 1, 1], [], []>} : vector<16x9xf32>, vector<16x32xf32>, vector<9x32xf32> -> vector<9x32xf32>
    %cst_52 = arith.constant dense<0.000000e+00> : vector<9xf32>
    %161 = vector.multi_reduction <add>, %160, %cst_52 [1] : vector<9x32xf32> to vector<9xf32>
    %162 = vector.shape_cast %161 : vector<9xf32> to vector<9x1xf32>
    %cst_53 = arith.constant 3.200000e+01 : f32
    %163 = vector.broadcast %cst_53 : f32 to vector<9x1xf32>
    %164 = arith.divf %162, %163 : vector<9x1xf32>
    %165 = vector.broadcast %164 : vector<9x1xf32> to vector<9x32xf32>
    %166 = arith.subf %160, %165 : vector<9x32xf32>
    %167 = arith.mulf %166, %166 : vector<9x32xf32>
    %cst_54 = arith.constant dense<0.000000e+00> : vector<9xf32>
    %168 = vector.multi_reduction <add>, %167, %cst_54 [1] : vector<9x32xf32> to vector<9xf32>
    %169 = vector.shape_cast %168 : vector<9xf32> to vector<9x1xf32>
    %cst_55 = arith.constant 3.200000e+01 : f32
    %170 = vector.broadcast %cst_55 : f32 to vector<9x1xf32>
    %171 = arith.divf %169, %170 : vector<9x1xf32>
    %172 = vector.broadcast %164 : vector<9x1xf32> to vector<9x32xf32>
    %173 = arith.subf %160, %172 : vector<9x32xf32>
    %cst_56 = arith.constant 9.99999997E-7 : f32
    %174 = vector.broadcast %cst_56 : f32 to vector<9x1xf32>
    %175 = arith.addf %171, %174 : vector<9x1xf32>
    %176 = math.rsqrt %175 : vector<9x1xf32>
    %177 = vector.broadcast %176 : vector<9x1xf32> to vector<9x32xf32>
    %178 = arith.mulf %173, %177 : vector<9x32xf32>
    %179 = vector.broadcast %10 : vector<1x32xf32> to vector<9x32xf32>
    %180 = arith.mulf %178, %179 : vector<9x32xf32>
    %181 = vector.broadcast %11 : vector<1x32xf32> to vector<9x32xf32>
    %182 = arith.addf %180, %181 : vector<9x32xf32>
    %183 = vector.extract_strided_slice %182 {offsets = [0, 0], sizes = [8, 32], strides = [1, 1]} : vector<9x32xf32> to vector<8x32xf32>
    %cst_57 = arith.constant dense<0.000000e+00> : vector<32xf32>
    %184 = vector.multi_reduction <add>, %183, %cst_57 [0] : vector<8x32xf32> to vector<32xf32>
    %185 = vector.shape_cast %184 : vector<32xf32> to vector<1x32xf32>
    %cst_58 = arith.constant 8.000000e+00 : f32
    %186 = vector.broadcast %cst_58 : f32 to vector<1x32xf32>
    %187 = arith.divf %185, %186 : vector<1x32xf32>
    %cst_59 = arith.constant dense<0xFF800000> : vector<9xf32>
    %188 = vector.multi_reduction <maximumf>, %142, %cst_59 [0] : vector<16x9xf32> to vector<9xf32>
    %189 = vector.shape_cast %188 : vector<9xf32> to vector<1x9xf32>
    %cst_60 = arith.constant 5.000000e-01 : f32
    %190 = vector.broadcast %cst_60 : f32 to vector<16x1xf32>
    %191 = arith.cmpf ogt, %150, %190 : vector<16x1xf32>
    %cst_61 = arith.constant -1.000000e+30 : f32
    %192 = vector.broadcast %cst_61 : f32 to vector<16x1xf32>
    %193 = arith.select %191, %143, %192 : vector<16x1xi1>, vector<16x1xf32>
    %cst_62 = arith.constant dense<0xFF800000> : vector<1xf32>
    %194 = vector.multi_reduction <maximumf>, %193, %cst_62 [0] : vector<16x1xf32> to vector<1xf32>
    %195 = vector.shape_cast %194 : vector<1xf32> to vector<1x1xf32>
    %196 = vector.broadcast %195 : vector<1x1xf32> to vector<16x1xf32>
    %197 = arith.subf %193, %196 : vector<16x1xf32>
    %198 = math.exp %197 : vector<16x1xf32>
    %cst_63 = arith.constant dense<0.000000e+00> : vector<1xf32>
    %199 = vector.multi_reduction <add>, %198, %cst_63 [0] : vector<16x1xf32> to vector<1xf32>
    %200 = vector.shape_cast %199 : vector<1xf32> to vector<1x1xf32>
    %201 = tpu.reciprocal %200 {approx = true} : vector<1x1xf32> -> vector<1x1xf32>
    %202 = vector.broadcast %201 : vector<1x1xf32> to vector<16x1xf32>
    %203 = arith.mulf %198, %202 : vector<16x1xf32>
    %cst_64 = arith.constant dense<0.000000e+00> : vector<1x32xf32>
    %204 = tpu.matmul %203, %141, %cst_64 {dimension_numbers = #tpu.dot_dimension_numbers<[0], [0], [1], [1], [0, 1, 1, 1], [], []>} : vector<16x1xf32>, vector<16x32xf32>, vector<1x32xf32> -> vector<1x32xf32>
    %cst_65 = arith.constant dense<0.000000e+00> : vector<1xf32>
    %205 = vector.multi_reduction <add>, %204, %cst_65 [1] : vector<1x32xf32> to vector<1xf32>
    %206 = vector.shape_cast %205 : vector<1xf32> to vector<1x1xf32>
    %cst_66 = arith.constant 3.200000e+01 : f32
    %207 = vector.broadcast %cst_66 : f32 to vector<1x1xf32>
    %208 = arith.divf %206, %207 : vector<1x1xf32>
    %209 = vector.broadcast %208 : vector<1x1xf32> to vector<1x32xf32>
    %210 = arith.subf %204, %209 : vector<1x32xf32>
    %211 = arith.mulf %210, %210 : vector<1x32xf32>
    %cst_67 = arith.constant dense<0.000000e+00> : vector<1xf32>
    %212 = vector.multi_reduction <add>, %211, %cst_67 [1] : vector<1x32xf32> to vector<1xf32>
    %213 = vector.shape_cast %212 : vector<1xf32> to vector<1x1xf32>
    %cst_68 = arith.constant 3.200000e+01 : f32
    %214 = vector.broadcast %cst_68 : f32 to vector<1x1xf32>
    %215 = arith.divf %213, %214 : vector<1x1xf32>
    %216 = vector.broadcast %208 : vector<1x1xf32> to vector<1x32xf32>
    %217 = arith.subf %204, %216 : vector<1x32xf32>
    %cst_69 = arith.constant 9.99999997E-7 : f32
    %218 = vector.broadcast %cst_69 : f32 to vector<1x1xf32>
    %219 = arith.addf %215, %218 : vector<1x1xf32>
    %220 = math.rsqrt %219 : vector<1x1xf32>
    %221 = vector.broadcast %220 : vector<1x1xf32> to vector<1x32xf32>
    %222 = arith.mulf %217, %221 : vector<1x32xf32>
    %223 = arith.mulf %222, %12 : vector<1x32xf32>
    %224 = arith.addf %223, %13 : vector<1x32xf32>
    %cst_70 = arith.constant 0.000000e+00 : f32
    %225 = vector.broadcast %cst_70 : f32 to vector<1x32xf32>
    %226 = tpu.concatenate %187, %225 in 1 : vector<1x32xf32>, vector<1x32xf32> -> vector<1x64xf32>
    %227 = tpu.concatenate %225, %224 in 1 : vector<1x32xf32>, vector<1x32xf32> -> vector<1x64xf32>
    %cst_71 = arith.constant 0.000000e+00 : f32
    %228 = vector.broadcast %cst_71 : f32 to vector<16x7xf32>
    %cst_72 = arith.constant 0.000000e+00 : f32
    %229 = vector.broadcast %cst_72 : f32 to vector<16x108xf32>
    %230 = tpu.concatenate %139, %228, %146, %147, %150, %152, %229 in 1 : vector<16x9xf32>, vector<16x7xf32>, vector<16x1xf32>, vector<16x1xf32>, vector<16x1xf32>, vector<16x1xf32>, vector<16x108xf32> -> vector<16x128xf32>
    %cst_73 = arith.constant 0.000000e+00 : f32
    %231 = vector.broadcast %cst_73 : f32 to vector<9x96xf32>
    %232 = tpu.concatenate %182, %231 in 1 : vector<9x32xf32>, vector<9x96xf32> -> vector<9x128xf32>
    %cst_74 = arith.constant 0.000000e+00 : f32
    %233 = vector.broadcast %cst_74 : f32 to vector<1x119xf32>
    %234 = tpu.concatenate %189, %233 in 1 : vector<1x9xf32>, vector<1x119xf32> -> vector<1x128xf32>
    %cst_75 = arith.constant 0.000000e+00 : f32
    %235 = vector.broadcast %cst_75 : f32 to vector<6x128xf32>
    %236 = tpu.concatenate %230, %232, %234, %235 in 0 : vector<16x128xf32>, vector<9x128xf32>, vector<1x128xf32>, vector<6x128xf32> -> vector<32x128xf32>
    %c1 = arith.constant 1 : index
    %c0_76 = arith.constant 0 : index
    %c0_77 = arith.constant 0 : index
    %237 = vector.load %arg5[%c1, %c0_76, %c0_77] : memref<2x32x128xf32, #tpu.memory_space<vmem>>, vector<1x32x128xf32>
    %238 = vector.shape_cast %237 : vector<1x32x128xf32> to vector<32x128xf32>
    %239 = vector.shape_cast %236 : vector<32x128xf32> to vector<1x32x128xf32>
    tpu.vector_store %arg5[%c1, %c0_76, %c0_77], %239 {strides = array<i32>} : memref<2x32x128xf32, #tpu.memory_space<vmem>>, vector<1x32x128xf32>,
    %240 = tpu.concatenate %125, %126, %226, %227 in 0 : vector<1x64xf32>, vector<1x64xf32>, vector<1x64xf32>, vector<1x64xf32> -> vector<4x64xf32>
    %241 = tpu.concatenate %6, %6 in 0 : vector<2x256xf32>, vector<2x256xf32> -> vector<4x256xf32>
    %cst_78 = arith.constant dense<0.000000e+00> : vector<4x256xf32>
    %242 = tpu.matmul %240, %5, %cst_78 {dimension_numbers = #tpu.dot_dimension_numbers<[1], [0], [0], [1], [0, 0, 1, 1], [], []>} : vector<4x64xf32>, vector<64x256xf32>, vector<4x256xf32> -> vector<4x256xf32>
    %243 = arith.addf %242, %241 : vector<4x256xf32>
    %c0_79 = arith.constant 0 : index
    %c0_80 = arith.constant 0 : index
    %244 = vector.load %arg6[%c0_79, %c0_80] : memref<4x256xf32, #tpu.memory_space<vmem>>, vector<4x256xf32>
    tpu.vector_store %arg6[%c0_79, %c0_80], %243 {strides = array<i32>} : memref<4x256xf32, #tpu.memory_space<vmem>>, vector<4x256xf32>,
    return
  }
  func.func @transform_0(%arg0: i32) -> (i32, i32) {
    %c0_i32 = arith.constant 0 : i32
    %c0_i32_0 = arith.constant 0 : i32
    %c0_i32_1 = arith.constant 0 : i32
    return %c0_i32, %c0_i32_0 : i32, i32
  }
  func.func @transform_1(%arg0: i32) -> (i32, i32) {
    %c0_i32 = arith.constant 0 : i32
    %c0_i32_0 = arith.constant 0 : i32
    %c0_i32_1 = arith.constant 0 : i32
    return %c0_i32, %c0_i32_0 : i32, i32
  }
  func.func @transform_2(%arg0: i32) -> (i32, i32) {
    %c0_i32 = arith.constant 0 : i32
    %c0_i32_0 = arith.constant 0 : i32
    %c0_i32_1 = arith.constant 0 : i32
    return %c0_i32, %c0_i32_0 : i32, i32
  }
  func.func @transform_3(%arg0: i32) -> (i32, i32) {
    %c0_i32 = arith.constant 0 : i32
    %c0_i32_0 = arith.constant 0 : i32
    %c0_i32_1 = arith.constant 0 : i32
    return %c0_i32, %c0_i32_0 : i32, i32
  }
  func.func @transform_4(%arg0: i32) -> (i32, i32, i32) {
    %c0_i32 = arith.constant 0 : i32
    %c0_i32_0 = arith.constant 0 : i32
    %c0_i32_1 = arith.constant 0 : i32
    %c0_i32_2 = arith.constant 0 : i32
    return %c0_i32, %c0_i32_0, %c0_i32_1 : i32, i32, i32
  }
  func.func @transform_5(%arg0: i32) -> (i32, i32) {
    %c0_i32 = arith.constant 0 : i32
    %c0_i32_0 = arith.constant 0 : i32
    %c0_i32_1 = arith.constant 0 : i32
    return %c0_i32, %c0_i32_0 : i32, i32
  }
}

</mosaic_0001>

<bundles_post_ra>
// kernel: full_two_stage_forward.1
= control target key start
LH: loop header
LB: loop body
LE: loop exit
PB: predicated region body
PF: predicated region fallthrough
CT: control target
= control target key end

     0   :  { %vm71_vm0 = vcmask 392192   ;;  %s1567_s11 = smov 32   ;;  %v67_v17 = vlaneseq  ;;  %vm65_vm1 = vcmask 261120   ;;  %vm319_vm2 = vcmask 523264   ;;  %s1570_s14 = smov 120   ;;  %s2056_s1 = inlined_call_operand.vmem [shape: f32[112,64], index: 1, kind: input, shape index: {}]   ;;  %s2057_s0 = inlined_call_operand.vmem [shape: f32[32,48], index: 0, kind: input, shape index: {}]   ;;  %s2058_s2 = inlined_call_operand.vmem [shape: f32[48,32], index: 2, kind: input, shape index: {}]   ;;  %s2059_s3 = inlined_call_operand.vmem [shape: f32[72,256], index: 3, kind: input, shape index: {}]   ;;  %s2060_s4 = inlined_call_operand.vmem [shape: f32[2,32,128], index: 4, kind: output, shape index: {0}]   ;;  %s2061_s5 = inlined_call_operand.vmem [shape: f32[4,256], index: 5, kind: output, shape index: {1}]  }
   0x1   :  { %v28_v0 = vld [vmem:[%s2056_s1 + $0x28] sm:$0xff]  ;;  %v27_v1 = vld [vmem:[%s2056_s1 + $0x20] sm:$0xff]  ;;  %v26_v2 = vld [vmem:[%s2056_s1 + $0x18] sm:$0xff]  ;;  %vm274_vm3 = vcmask 72704   ;;  %vm413_vm4 = vcmask 64512   ;;  %vm623_vm8 = vcmask 72768  }
   0x2   :  { %1423 = vmatprep.subr.mxu0 %v28_v0  ;;  %v19_v3 = vld [vmem:[%s2057_s0] sm:$0xff]  ;;  %v25_v6 = vld [vmem:[%s2056_s1 + $0x10] sm:$0xff]  ;;  %v40_v8 = vld [vmem:[%s2058_s2 + $0x18] sm:$0xff]  ;;  %v1661_v18 = vshrl.u32 %v67_v17, 7  ;;  %vm473_vm14 = vcmask 130048   ;;  %vm1571_vm15 = vmmov 0  }
   0x3   :  { %1424 = vmatpush3.msra.mxu0 %v28_v0  ;;  %1435 = vmatprep.mubr.msk.f32.mxu0 %vm71_vm0, %v19_v3  ;;  %v1621_v4 = vld [vmem:[%s2058_s2] sm:$0xff]  ;;  %v24_v9 = vld [vmem:[%s2056_s1 + $0x8] sm:$0xff]  ;;  %v21_v12 = vld [vmem:[%s2057_s0 + $0x10] sm:$0xff]  ;;  %s1572_s24 = smov 9   ;;  %s1574_s25 = smov 11  }
   0x4   :  { %1425 = vmatprep.subr.mxu0 %v27_v1  ;;  %v41_v5 = vld [vmem:[%s2058_s2 + $0x20] sm:$0xff]  ;;  %v61_v7 = vrot.slane %v1621_v4, 1  ;;  %v20_v11 = vld [vmem:[%s2057_s0 + $0x8] sm:$0xff]  ;;  %v22_v13 = vld [vmem:[%s2057_s0 + $0x18] sm:$0xff]  ;;  %v69_v20 = vsub.s32 0, %v1661_v18  ;;  %v268_v38 = vsub.s32 6, %v1661_v18 }
   0x5   :  { %1426 = vmatpush3.msra.mxu0 %v27_v1  ;;  %1441 = vmatprep.subr.mxu1 %v41_v5  ;;  %v23_v10 = vld [vmem:[%s2056_s1] sm:$0xff]  ;;  %v39_v14 = vld [vmem:[%s2058_s2 + $0x10] sm:$0xff]  ;;  %v38_v15 = vld [vmem:[%s2058_s2 + $0x8] sm:$0xff] }
   0x6   :  { %1427 = vmatprep.subr.mxu0 %v26_v2  ;;  %1442 = vmatpush3.msra.mxu1 %v41_v5  ;;  %v36_v16 = vld [vmem:[%s2056_s1 + $0x68] sm:$0xff]  ;;  %v35_v28 = vld [vmem:[%s2056_s1 + $0x60] sm:$0xff]  ;;  %v34_v31 = vld [vmem:[%s2056_s1 + $0x58] sm:$0xff]  ;;  %v269_v39 = vrot.slane %v1621_v4, %v268_v38 }
   0x7   :  { %1428 = vmatpush3.msra.mxu0 %v26_v2  ;;  %62 = vrot.lane.b32.xlu0 %v61_v7, %s1567_s11  ;;  %v33_v33 = vld [vmem:[%s2056_s1 + $0x50] sm:$0xff]  ;;  %v32_v34 = vld [vmem:[%s2056_s1 + $0x48] sm:$0xff]  ;;  %v31_v35 = vld [vmem:[%s2056_s1 + $0x40] sm:$0xff] }
   0x8   :  { %1429 = vmatprep.subr.mxu0 %v25_v6  ;;  %1443 = vmatprep.subr.mxu1 %v40_v8  ;;  %v30_v36 = vld [vmem:[%s2056_s1 + $0x38] sm:$0xff]  ;;  %v29_v37 = vld [vmem:[%s2056_s1 + $0x30] sm:$0xff]  ;;  %s1568_s1 = smov 104  }
   0x9   :  { %1430 = vmatpush3.msra.mxu0 %v25_v6  ;;  %1444 = vmatpush3.msra.mxu1 %v40_v8 }
   0xa   :  { %1431 = vmatprep.subr.mxu0 %v24_v9  ;;  %1445 = vmatprep.subr.mxu1 %v39_v14 }
   0xb   :  { %1432 = vmatpush3.msra.mxu0 %v24_v9  ;;  %1446 = vmatpush3.msra.mxu1 %v39_v14 }
   0xc   :  { %1433 = vmatprep.subr.mxu0 %v23_v10  ;;  %1447 = vmatprep.subr.mxu1 %v38_v15 }
   0xd   :  { %1434 = vmatpush3.msra.mxu0 %v23_v10  ;;  %1448 = vmatpush3.msra.mxu1 %v38_v15 }
   0xe   :  { %1436 = vmatmul.mubr.msk.f32.vlgmr.msra.gmra.mxu0 %vm71_vm0, %v20_v11  ;;  %1455 = vmatprep.subr.mxu1 %v36_v16 }
   0xf   :  { %1438 = vmatprep.mubr.msk.f32.mxu0 %vm71_vm0, %v21_v12 }
  0x12   :  { %1439 = vmatmul.mubr.msk.f32.gmra.mxu0 %vm71_vm0, %v22_v13  ;;  %v1569_v13 = vmov 0.0   ;;  %vm558_vm0 = vcmask 253952  }
  0x79   :  { %v63_v19 = vpop.permute.xlu0 %62 }
  0x7a   :  { %v66_v21 = vsel %vm65_vm1, %v1621_v4, %v63_v19 }
  0x7b   :  { %v70_v22 = vrot.slane %v66_v21, %v69_v20 }
  0xce   :  { %v1437_v23 = vpop.f32.mrf.mxu0 }
  0xcf   :  { %v156_v24 = vadd.f32 %v1437_v23, %v70_v22 }
  0xd0   :  { %v150_v25 = vpop.f32.mrf.mxu0 }
  0xd1   :  { %v151_v26 = vadd.f32 %v150_v25, %v70_v22  ;;  %1477 = vmatprep.subr.mxu0 %v156_v24 }
  0xd2   :  { %v1440_v27 = vpop.f32.mrf.mxu0  ;;  %1478 = vmatpush3.msra.mxu0 %v156_v24 }
  0xd3   :  { %1449 = vmatprep.mubr.msk.f32.mxu1 %vm65_vm1, %v151_v26  ;;  %1479 = vmatprep.subr.mxu0 %v151_v26  ;;  %v1676_v32 = vadd.f32 %v1440_v27, %v70_v22 }
  0xd4   :  { %v160_v29 = vpop.f32.mrf.mxu0  ;;  %1450 = vmatmul.mubr.msk.f32.vlgmr.msra.gmra.mxu1 %vm65_vm1, %v156_v24  ;;  %1480 = vmatpush3.msra.mxu0 %v151_v26 }
  0xd5   :  { %v1671_v30 = vadd.f32 %v160_v29, %v70_v22  ;;  %1456 = vmatpush3.msra.mxu1 %v36_v16  ;;  %1484 = vmatprep.subr.mxu0 %v1569_v13 }
  0xd6   :  { %1457 = vmatprep.subr.mxu1 %v35_v28 }
  0xd7   :  { %1458 = vmatpush3.msra.mxu1 %v35_v28  ;;  %1452 = vmatprep.mubr.msk.f32.mxu1 %vm65_vm1, %v1671_v30 }
  0xd8   :  { %1459 = vmatprep.subr.mxu1 %v34_v31  ;;  %1453 = vmatmul.mubr.msk.f32.gmra.mxu1 %vm65_vm1, %v1676_v32 }
  0xd9   :  { %1460 = vmatpush3.msra.mxu1 %v34_v31  ;;  %1471 = vmatprep.mubr.msk.f32.mxu1 %vm319_vm2, %v151_v26 }
  0xda   :  { %1461 = vmatprep.subr.mxu1 %v33_v33 }
  0xdb   :  { %1462 = vmatpush3.msra.mxu1 %v33_v33 }
  0xdc   :  { %1463 = vmatprep.subr.mxu1 %v32_v34 }
  0xdd   :  { %1464 = vmatpush3.msra.mxu1 %v32_v34 }
  0xde   :  { %1465 = vmatprep.subr.mxu1 %v31_v35 }
  0xdf   :  { %1466 = vmatpush3.msra.mxu1 %v31_v35 }
  0xe0   :  { %1467 = vmatprep.subr.mxu1 %v30_v36 }
  0xe1   :  { %1468 = vmatpush3.msra.mxu1 %v30_v36 }
  0xe2   :  { %1469 = vmatprep.subr.mxu1 %v29_v37 }
  0xe3   :  { %1470 = vmatpush3.msra.mxu1 %v29_v37 }
  0xe4   :  { %1472 = vmatmul.mubr.msk.f32.vlgmr.msra.gmra.mxu1 %vm319_vm2, %v156_v24 }
  0xe5   :  { %1474 = vmatprep.mubr.msk.f32.mxu1 %vm319_vm2, %v1671_v30 }
  0xe8   :  { %1475 = vmatmul.mubr.msk.f32.gmra.mxu1 %vm319_vm2, %v1676_v32 }
  0xe9   :  { %1332 = vmatprep.mubr.f32.mxu1 %v1569_v13 }
 0x194   :  { %v1451_v40 = vpop.f32.mrf.mxu1 }
 0x195   :  { %v271_v41 = vadd.f32 %v1451_v40, %v269_v39 }
 0x196   :  { %v247_v42 = vpop.f32.mrf.mxu1 }
 0x197   :  { %v270_v43 = vadd.f32 %v269_v39, %v247_v42  ;;  %v278_v44 = vsel %vm274_vm3, %v271_v41, -inf }
 0x198   :  { %279 = vmax.xlane.f32.xlu1 %v278_v44  ;;  %v1454_v45 = vpop.f32.mrf.mxu1 }
 0x199   :  { %v273_v46 = vadd.f32 %v1454_v45, %v269_v39  ;;  %v275_v47 = vsel %vm274_vm3, %v270_v43, -inf }
 0x19a   :  { %276 = vmax.xlane.f32.xlu0 %v275_v47  ;;  %v1707_v48 = vmax.f32 %v275_v47, %v278_v44  ;;  %v257_v49 = vpop.f32.mrf.mxu1 }
 0x19b   :  { %v272_v50 = vadd.f32 %v269_v39, %v257_v49  ;;  %v284_v52 = vsel %vm274_vm3, %v273_v46, -inf }
 0x19d   :  { %v281_v51 = vsel %vm274_vm3, %v272_v50, -inf }
 0x19e   :  { %282 = vmax.xlane.f32.xlu1 %v281_v51  ;;  %v1711_v53 = vmax.f32 %v281_v51, %v284_v52 }
 0x1a2   :  { %285 = vmax.xlane.f32.xlu1 %v284_v52 }
 0x1a4   :  { %v1713_v54 = vpop.f32.mrf.mxu1 }
 0x1a6   :  { %v1715_v55 = vpop.f32.mrf.mxu1 }
 0x1a8   :  { %v1739_v33 = vpop.f32.mrf.mxu1 }
 0x1aa   :  { %v1741_v34 = vpop.f32.mrf.mxu1 }
 0x1b0   :  { %615 = vrot.lane.b32.xlu0 %v1715_v55, %s1568_s1 }
 0x221   :  { %v280_v56 = vpop.xlane.xlu1 %279 }
 0x222   :  { %v288_v57 = vsub.f32 %v271_v41, %v280_v56 }
 0x223   :  { %v277_v58 = vpop.xlane.xlu0 %276 }
 0x224   :  { %v293_v59 = vmul.f32 1.442695, %v288_v57  ;;  %v287_v60 = vsub.f32 %v270_v43, %v277_v58 }
 0x226   :  { %1523 = vpow2.f32 %v293_v59  ;;  %v291_v61 = vmul.f32 1.442695, %v287_v60 }
 0x227   :  { %v283_v62 = vpop.xlane.xlu1 %282  ;;  %v616_v38 = vpop.permute.xlu0 %615 }
 0x228   :  { %1525 = vpow2.f32 %v291_v61  ;;  %v289_v63 = vsub.f32 %v272_v50, %v283_v62 }
 0x22a   :  { %v295_v0 = vmul.f32 1.442695, %v289_v63 }
 0x22b   :  { %v286_v1 = vpop.xlane.xlu1 %285 }
 0x22c   :  { %1527 = vpow2.f32 %v295_v0  ;;  %v290_v2 = vsub.f32 %v273_v46, %v286_v1 }
 0x22e   :  { %v297_v3 = vmul.f32 1.442695, %v290_v2 }
 0x230   :  { %1529 = vpow2.f32 %v297_v3 }
 0x233   :  { %v1524_v5 = vpop.eup %1523 }
 0x234   :  { %v302_v6 = vsel %vm274_vm3, %v1524_v5, 0.0 }
 0x235   :  { %v1526_v7 = vpop.eup %1525  ;;  %303 = vadd.xlane.f32.xlu1 %v302_v6 }
 0x236   :  { %v299_v8 = vsel %vm274_vm3, %v1526_v7, 0.0 }
 0x239   :  { %v1528_v9 = vpop.eup %1527  ;;  %300 = vadd.xlane.f32.xlu1 %v299_v8 }
 0x23a   :  { %v305_v10 = vsel %vm274_vm3, %v1528_v9, 0.0 }
 0x23d   :  { %v1530_v11 = vpop.eup %1529  ;;  %306 = vadd.xlane.f32.xlu1 %v305_v10 }
 0x23e   :  { %v308_v12 = vsel %vm274_vm3, %v1530_v11, 0.0 }
 0x241   :  { %309 = vadd.xlane.f32.xlu1 %v308_v12 }
 0x252   :  { %617 = vrot.lane.b32.xlu1 %v1713_v54, %s1568_s1 }
 0x2be   :  { %v304_v14 = vpop.xlane.xlu1 %303 }
 0x2bf   :  { %1531 = vrcp.f32 %v304_v14 }
 0x2c2   :  { %v301_v15 = vpop.xlane.xlu1 %300 }
 0x2c3   :  { %1533 = vrcp.f32 %v301_v15 }
 0x2c6   :  { %v307_v16 = vpop.xlane.xlu1 %306 }
 0x2c7   :  { %1535 = vrcp.f32 %v307_v16 }
 0x2ca   :  { %v310_v17 = vpop.xlane.xlu1 %309 }
 0x2cb   :  { %1537 = vrcp.f32 %v310_v17 }
 0x2cc   :  { %v1532_v19 = vpop.eup %1531 }
 0x2cd   :  { %v1727_v20 = vmul.f32 %v1532_v19, %v1524_v5 }
 0x2ce   :  { %v618_v35 = vpop.permute.xlu1 %617 }
 0x2cf   :  { %v417_v21 = vsel %vm413_vm4, %v1727_v20, -inf }
 0x2d0   :  { %v1534_v22 = vpop.eup %1533  ;;  %418 = vmax.xlane.f32.xlu1 %v417_v21 }
 0x2d1   :  { %v1730_v23 = vmul.f32 %v1534_v22, %v1526_v7 }
 0x2d3   :  { %v414_v24 = vsel %vm413_vm4, %v1730_v23, -inf }
 0x2d4   :  { %v1536_v25 = vpop.eup %1535  ;;  %415 = vmax.xlane.f32.xlu1 %v414_v24 }
 0x2d5   :  { %v1733_v26 = vmul.f32 %v1536_v25, %v1528_v9 }
 0x2d7   :  { %v840_v27 = vsel %vm413_vm4, %v1733_v26, -inf }
 0x2d8   :  { %v1538_v28 = vpop.eup %1537  ;;  %841 = vmax.xlane.f32.xlu0 %v840_v27 }
 0x2d9   :  { %v1736_v29 = vmul.f32 %v1538_v28, %v1530_v11 }
 0x2db   :  { %v843_v31 = vsel %vm413_vm4, %v1736_v29, -inf  ;;  %vm832_vm4 = vcmask 1040384  }
 0x2dc   :  { %844 = vmax.xlane.f32.xlu1 %v843_v31 }
 0x2ed   :  { %1029 = vrot.lane.b32.xlu1 %v1741_v34, %s1568_s1 }
 0x2ee   :  { %1031 = vrot.lane.b32.xlu0 %v1739_v33, %s1568_s1 }
 0x359   :  { %v1747_v36 = vpop.xlane.xlu1 %418 }
 0x35a   :  { %vm421_vm5 = vcmp.ge.f32.partialorder %v1747_v36, %v1727_v20 }
 0x35b   :  { %v1752_v37 = vsel %vm421_vm5, 1.0, %v1569_v13  ;;  %vm834_vm5 = vcmask 1041408  }
 0x35c   :  { %vm612_vm6 = vcmp.gt.f32.partialorder %v1752_v37, 0.5 }
 0x35d   :  { %v1755_v39 = vpop.xlane.xlu1 %415  ;;  %v622_v40 = vsel %vm612_vm6, %v618_v35, -1e+30  ;;  %vm1255_vm6 = vcmask 1042432  }
 0x35e   :  { %vm420_vm7 = vcmp.ge.f32.partialorder %v1755_v39, %v1730_v23  ;;  %v625_v45 = vsel %vm623_vm8, %v622_v40, -inf }
 0x35f   :  { %v1760_v41 = vsel %vm420_vm7, 1.0, %v1569_v13  ;;  %vm815_vm7 = vcmask 138240  }
 0x360   :  { %vm611_vm9 = vcmp.gt.f32.partialorder %v1760_v41, 0.5  ;;  %v1513_v42 = vpack.i.bf16 %v1752_v37, %v1760_v41 }
 0x361   :  { %v621_v43 = vsel %vm611_vm9, %v616_v38, -1e+30  ;;  %v1765_v44 = vpop.xlane.xlu0 %841  ;;  %vm824_vm9 = vcmask 162816  }
 0x362   :  { %v624_v46 = vsel %vm623_vm8, %v621_v43, -inf  ;;  %vm846_vm10 = vcmp.ge.f32.partialorder %v1765_v44, %v1733_v26 }
 0x363   :  { %v626_v47 = vmax.f32 %v624_v46, %v625_v45  ;;  %v1774_v51 = vsel %vm846_vm10, 1.0, %v1569_v13 }
 0x364   :  { %vm1025_vm13 = vcmp.gt.f32.partialorder %v1774_v51, 0.5 }
 0x365   :  { %v627_v49 = vrot.slane %v626_v47, 4  ;;  %v1771_v50 = vpop.xlane.xlu1 %844  ;;  %v1032_v57 = vpop.permute.xlu0 %1031 }
 0x366   :  { %vm847_vm11 = vcmp.ge.f32.partialorder %v1771_v50, %v1736_v29 }
 0x367   :  { %v628_v52 = vmax.f32 %v626_v47, %v627_v49  ;;  %v1779_v56 = vsel %vm847_vm11, 1.0, %v1569_v13 }
 0x368   :  { %vm1026_vm12 = vcmp.gt.f32.partialorder %v1779_v56, 0.5  ;;  %v1518_v58 = vpack.i.bf16 %v1779_v56, %v1774_v51 }
 0x369   :  { %v629_v59 = vrot.slane %v628_v52, 2  ;;  %v1036_v60 = vsel %vm1026_vm12, %v1032_v57, -1e+30  ;;  %v1030_v61 = vpop.permute.xlu1 %1029 }
 0x36a   :  { %v1038_v62 = vsel %vm623_vm8, %v1036_v60, -inf  ;;  %v1035_v63 = vsel %vm1025_vm13, %v1030_v61, -1e+30 }
 0x36b   :  { %v630_v0 = vmax.f32 %v628_v52, %v629_v59  ;;  %v1037_v1 = vsel %vm623_vm8, %v1035_v63, -inf }
 0x36c   :  { %v1039_v2 = vmax.f32 %v1037_v1, %v1038_v62 }
 0x36d   :  { %v631_v3 = vrot.slane %v630_v0, 1 }
 0x36e   :  { %v1040_v5 = vrot.slane %v1039_v2, 4 }
 0x36f   :  { %v632_v6 = vmax.f32 %v630_v0, %v631_v3  ;;  %v1793_v3 = vsel %vm274_vm3, %v1730_v23, 0.0 }
 0x370   :  { %v1041_v7 = vmax.f32 %v1039_v2, %v1040_v5 }
 0x371   :  { %v633_v8 = vsub.f32 %v621_v43, %v632_v6  ;;  %v634_v9 = vsub.f32 %v622_v40, %v632_v6 }
 0x372   :  { %v1042_v10 = vrot.slane %v1041_v7, 2 }
 0x373   :  { %v635_v11 = vmul.f32 1.442695, %v633_v8  ;;  %v637_v12 = vmul.f32 1.442695, %v634_v9 }
 0x374   :  { %v1043_v14 = vmax.f32 %v1041_v7, %v1042_v10  ;;  %v1797_v7 = vsel %vm274_vm3, %v1727_v20, 0.0 }
 0x375   :  { %1539 = vpow2.f32 %v635_v11  ;;  %v430_v8 = vadd.f32 %v1797_v7, %v1793_v3 }
 0x376   :  { %1541 = vpow2.f32 %v637_v12  ;;  %v1044_v15 = vrot.slane %v1043_v14, 1 }
 0x377   :  { %v431_v9 = vrot.slane %v430_v8, 4 }
 0x378   :  { %v1045_v16 = vmax.f32 %v1043_v14, %v1044_v15 }
 0x379   :  { %v432_v14 = vadd.f32 %v431_v9, %v430_v8 }
 0x37a   :  { %v1046_v17 = vsub.f32 %v1035_v63, %v1045_v16  ;;  %v1047_v19 = vsub.f32 %v1036_v60, %v1045_v16 }
 0x37b   :  { %v433_v15 = vrot.slane %v432_v14, 2 }
 0x37c   :  { %v1048_v21 = vmul.f32 1.442695, %v1046_v17  ;;  %v1050_v22 = vmul.f32 1.442695, %v1047_v19 }
 0x37d   :  { %v434_v16 = vadd.f32 %v433_v15, %v432_v14 }
 0x37e   :  { %1543 = vpow2.f32 %v1048_v21 }
 0x37f   :  { %1545 = vpow2.f32 %v1050_v22  ;;  %v435_v17 = vrot.slane %v434_v16, 1 }
 0x381   :  { %v436_v19 = vadd.f32 %v435_v17, %v434_v16 }
 0x382   :  { %v1540_v24 = vpop.eup %1539 }
 0x383   :  { %v1542_v25 = vpop.eup %1541  ;;  %v639_v27 = vsel %vm623_vm8, %v1540_v24, 0.0  ;;  %v437_v21 = vadd.f32 1e-06, %v436_v19 }
 0x384   :  { %v640_v28 = vsel %vm623_vm8, %v1542_v25, 0.0 }
 0x385   :  { %v641_v31 = vadd.f32 %v640_v28, %v639_v27  ;;  %v1805_v27 = vsel %vm274_vm3, %v1736_v29, 0.0  ;;  %v1809_v28 = vsel %vm274_vm3, %v1733_v26, 0.0 }
 0x387   :  { %v642_v35 = vrot.slane %v641_v31, 4 }
 0x389   :  { %v643_v38 = vadd.f32 %v642_v35, %v641_v31  ;;  %v856_v31 = vadd.f32 %v1805_v27, %v1809_v28 }
 0x38b   :  { %v1544_v40 = vpop.eup %1543  ;;  %v644_v43 = vrot.slane %v643_v38, 2  ;;  %v857_v35 = vrot.slane %v856_v31, 4 }
 0x38c   :  { %v1546_v45 = vpop.eup %1545  ;;  %v1052_v46 = vsel %vm623_vm8, %v1544_v40, 0.0 }
 0x38d   :  { %v1053_v47 = vsel %vm623_vm8, %v1546_v45, 0.0  ;;  %v645_v49 = vadd.f32 %v644_v43, %v643_v38  ;;  %v858_v38 = vadd.f32 %v857_v35, %v856_v31  ;;  %vm821_vm8 = vcmask 154624  }
 0x38e   :  { %v1054_v52 = vadd.f32 %v1053_v47, %v1052_v46 }
 0x38f   :  { %v646_v57 = vrot.slane %v645_v49, 1 }
 0x390   :  { %v1055_v59 = vrot.slane %v1054_v52, 4 }
 0x391   :  { %v647_v60 = vadd.f32 %v646_v57, %v645_v49 }
 0x392   :  { %v1056_v61 = vadd.f32 %v1055_v59, %v1054_v52 }
 0x393   :  { %1547 = vrcp.f32 %v647_v60 }
 0x394   :  { %v1057_v62 = vrot.slane %v1056_v61, 2 }
 0x396   :  { %v1058_v63 = vadd.f32 %v1057_v62, %v1056_v61 }
 0x398   :  { %v1059_v0 = vrot.slane %v1058_v63, 1 }
 0x39a   :  { %v1060_v1 = vadd.f32 %v1059_v0, %v1058_v63 }
 0x39c   :  { %1549 = vrcp.f32 %v1060_v1 }
 0x39d   :  { %1551 = vrcp.f32 %v437_v21 }
 0x3a0   :  { %v1548_v2 = vpop.eup %1547 }
 0x3a1   :  { %v650_v5 = vmul.f32 %v1548_v2, %v1542_v25  ;;  %v649_v6 = vmul.f32 %v1548_v2, %v1540_v24 }
 0x3a3   :  { %655 = vrot.lane.b32.xlu0 %v650_v5, %s1570_s14  ;;  %653 = vrot.lane.b32.xlu1 %v649_v6, %s1570_s14 }
 0x3a9   :  { %v1550_v10 = vpop.eup %1549 }
 0x3aa   :  { %v1063_v11 = vmul.f32 %v1550_v10, %v1546_v45  ;;  %v1062_v12 = vmul.f32 %v1550_v10, %v1544_v40  ;;  %v1552_v22 = vpop.eup %1551  ;;  %v859_v40 = vrot.slane %v858_v38, 2 }
 0x3ab   :  { %v439_v24 = vmul.f32 %v1552_v22, %v1730_v23  ;;  %v440_v25 = vmul.f32 %v1552_v22, %v1727_v20 }
 0x3ac   :  { %1068 = vrot.lane.b32.xlu0 %v1063_v11, %s1570_s14  ;;  %1066 = vrot.lane.b32.xlu1 %v1062_v12, %s1570_s14  ;;  %v860_v43 = vadd.f32 %v859_v40, %v858_v38 }
 0x3ae   :  { %v861_v45 = vrot.slane %v860_v43, 1 }
 0x3b0   :  { %v862_v46 = vadd.f32 %v861_v45, %v860_v43 }
 0x3b2   :  { %v863_v47 = vadd.f32 1e-06, %v862_v46 }
 0x3b4   :  { %1553 = vrcp.f32 %v863_v47 }
 0x3c1   :  { %v1554_v52 = vpop.eup %1553 }
 0x3c2   :  { %v865_v59 = vmul.f32 %v1554_v52, %v1733_v26  ;;  %v866_v61 = vmul.f32 %v1554_v52, %v1736_v29 }
 0x3d5   :  { %441 = vxpose.xlu1.b32.start [1/2] (short) (narrow) %v439_v24, 16 }
 0x3d9   :  { %442 = vxpose.xlu1.b32.end [2/2] (short) (narrow) %v440_v25, 16 }
 0x415   :  { %v654_v49 = vpop.permute.xlu1 %653  ;;  %v656_v57 = vpop.permute.xlu0 %655 }
 0x416   :  { %659 = vxpose.xlu0.b32.start [1/2] (short) (narrow) %v654_v49, 8 }
 0x41a   :  { %660 = vxpose.xlu0.b32.end [2/2] (short) (narrow) %v656_v57, 8 }
 0x41e   :  { %867 = vxpose.xlu0.b32.start [1/2] (short) (narrow) %v865_v59, 16  ;;  %v1067_v60 = vpop.permute.xlu1 %1066  ;;  %v1069_v62 = vpop.permute.xlu0 %1068 }
 0x41f   :  { %1072 = vxpose.xlu1.b32.start [1/2] (short) (narrow) %v1067_v60, 8 }
 0x422   :  { %868 = vxpose.xlu0.b32.end [2/2] (short) (narrow) %v866_v61, 16 }
 0x423   :  { %1073 = vxpose.xlu1.b32.end [2/2] (short) (narrow) %v1069_v62, 8 }
 0x451   :  { %v457_v63 = vpop.trf.xlu1 }
 0x452   :  { %1481 = vmatprep.mubr.msk.f32.mxu0 %vm473_vm14, %v457_v63 }
 0x455   :  { %v458_v0 = vpop.trf.xlu1 }
 0x456   :  { %1482 = vmatmul.mubr.msk.f32.vlgmr.msra.gmra.mxu0 %vm473_vm14, %v458_v0 }
 0x457   :  { %1485 = vmatpush3.msra.mxu0 %v1713_v54  ;;  %1488 = vmatprep.mubr.msk.f32.mxu0 %vm1571_vm15, %v1569_v13 }
 0x458   :  { %1486 = vmatprep.subr.mxu0 %v1569_v13 }
 0x459   :  { %1487 = vmatpush3.msra.mxu0 %v1715_v55 }
 0x45a   :  { %1491 = vmatprep.subr.mxu0 %v1676_v32 }
 0x492   :  { %v675_v1 = vpop.trf.xlu0 }
 0x493   :  { %1489 = vmatmul.mubr.msk.f32.vlgmr.msra.gmra.mxu0 %vm473_vm14, %v675_v1  ;;  %v57_v1 = vld [vmem:[%s2059_s3 + $0x78] sm:$0xff] }
 0x494   :  { %1492 = vmatpush3.msra.mxu0 %v1676_v32  ;;  %1284 = vmatprep.subr.mxu1 %v57_v1 }
 0x495   :  { %1493 = vmatprep.subr.mxu0 %v1671_v30 }
 0x496   :  { %1494 = vmatpush3.msra.mxu0 %v1671_v30 }
 0x497   :  { %1498 = vmatprep.subr.mxu0 %v1569_v13 }
 0x49a   :  { %v883_v54 = vpop.trf.xlu0 }
 0x49b   :  { %1495 = vmatprep.mubr.msk.f32.mxu0 %vm473_vm14, %v883_v54  ;;  %v1088_v55 = vpop.trf.xlu1  ;;  %v56_v54 = vld [vmem:[%s2059_s3 + $0x70] sm:$0xff] }
 0x49c   :  { %1285 = vmatpush1.msra.mxu1 %v56_v54 }
 0x49e   :  { %v884_v2 = vpop.trf.xlu0 }
 0x49f   :  { %1496 = vmatmul.mubr.msk.f32.vlgmr.msra.gmra.mxu0 %vm473_vm14, %v884_v2  ;;  %v55_v2 = vld [vmem:[%s2059_s3 + $0x68] sm:$0xff] }
 0x4a0   :  { %1499 = vmatpush3.msra.mxu0 %v1739_v33  ;;  %1502 = vmatprep.mubr.msk.f32.mxu0 %vm1571_vm15, %v1569_v13 }
 0x4a1   :  { %1500 = vmatprep.subr.mxu0 %v1569_v13  ;;  %1286 = vmatprep.subr.mxu1 %v55_v2 }
 0x4a2   :  { %1501 = vmatpush3.msra.mxu0 %v1741_v34 }
 0x4a3   :  { %1503 = vmatmul.mubr.msk.f32.vlgmr.msra.gmra.mxu0 %vm473_vm14, %v1088_v55 }
 0x516   :  { %v1836_v30 = vpop.f32.mrf.mxu0 }
 0x518   :  { %v546_v32 = vpop.f32.mrf.mxu0 }
 0x519   :  { %v555_v12 = vsel %vm65_vm1, %v546_v32, 0.0 }
 0x553   :  { %v760_v5 = vpop.f32.mrf.mxu0 }
 0x554   :  { %v764_v6 = vsel %vm558_vm0, %v760_v5, 0.0 }
 0x555   :  { %765 = vadd.xlane.f32.xlu0 %v764_v6  ;;  %v1490_v8 = vpop.f32.mrf.mxu0  ;;  %v54_v6 = vld [vmem:[%s2059_s3 + $0x60] sm:$0xff] }
 0x556   :  { %1287 = vmatpush1.msra.mxu1 %v54_v6  ;;  %v426_v6 = vsub.f32 1.0, %v1760_v41 }
 0x55f   :  { %v1839_v33 = vpop.f32.mrf.mxu0 }
 0x561   :  { %v971_v9 = vpop.f32.mrf.mxu0 }
 0x562   :  { %v980_v10 = vsel %vm65_vm1, %v971_v9, 0.0 }
 0x563   :  { %981 = vadd.xlane.f32.xlu0 %v980_v10  ;;  %v1173_v13 = vpop.f32.mrf.mxu0 }
 0x564   :  { %v1177_v34 = vsel %vm558_vm0, %v1173_v13, 0.0 }
 0x565   :  { %1178 = vadd.xlane.f32.xlu1 %v1177_v34  ;;  %v1504_v11 = vpop.f32.mrf.mxu0  ;;  %v780_v34 = vrot.slane %v1621_v4, 5 }
 0x566   :  { %v52_v11 = vld [vmem:[%s2059_s3 + $0x50] sm:$0xff] }
 0x569   :  { %556 = vadd.xlane.f32.xlu1 %v555_v12 }
 0x5de   :  { %v766_v14 = vpop.xlane.xlu0 %765 }
 0x5df   :  { %v767_v15 = vmul.f32 0.03125, %v766_v14  ;;  %v51_v14 = vld [vmem:[%s2059_s3 + $0x48] sm:$0xff] }
 0x5e1   :  { %v768_v16 = vsub.f32 %v760_v5, %v767_v15  ;;  %v777_v5 = vrot.slane %v1621_v4, 4 }
 0x5e3   :  { %v769_v17 = vmul.f32 %v768_v16, %v768_v16 }
 0x5e5   :  { %v770_v19 = vsel %vm558_vm0, %v769_v17, 0.0 }
 0x5e6   :  { %771 = vadd.xlane.f32.xlu0 %v770_v19  ;;  %v49_v19 = vld [vmem:[%s2059_s3 + $0x38] sm:$0xff] }
 0x5ec   :  { %v982_v21 = vpop.xlane.xlu0 %981 }
 0x5ed   :  { %v986_v22 = vmul.f32 0.03125, %v982_v21 }
 0x5ee   :  { %v1179_v24 = vpop.xlane.xlu1 %1178 }
 0x5ef   :  { %v1845_v25 = vsub.f32 %v971_v9, %v986_v22  ;;  %v1180_v31 = vmul.f32 0.03125, %v1179_v24  ;;  %v53_v9 = vld [vmem:[%s2059_s3 + $0x58] sm:$0xff]  ;;  %v48_v24 = vld [vmem:[%s2059_s3 + $0x30] sm:$0xff] }
 0x5f0   :  { %1288 = vmatprep.subr.mxu1 %v53_v9 }
 0x5f1   :  { %v1847_v35 = vsub.f32 %v1173_v13, %v1180_v31  ;;  %v990_v38 = vmul.f32 %v1845_v25, %v1845_v25  ;;  %1289 = vmatpush1.msra.mxu1 %v52_v11  ;;  %v47_v31 = vld [vmem:[%s2059_s3 + $0x28] sm:$0xff] }
 0x5f2   :  { %v557_v40 = vpop.xlane.xlu1 %556  ;;  %1290 = vmatprep.subr.mxu1 %v51_v14 }
 0x5f3   :  { %v563_v43 = vmul.f32 0.03125, %v557_v40  ;;  %v992_v45 = vsel %vm65_vm1, %v990_v38, 0.0  ;;  %v1182_v46 = vmul.f32 %v1847_v35, %v1847_v35  ;;  %v46_v38 = vld [vmem:[%s2059_s3 + $0x20] sm:$0xff]  ;;  %v585_v40 = vsub.s32 2, %v1661_v18 }
 0x5f4   :  { %993 = vadd.xlane.f32.xlu0 %v992_v45  ;;  %v591_v45 = vsub.s32 3, %v1661_v18 }
 0x5f5   :  { %v1854_v47 = vsub.f32 %v546_v32, %v563_v43  ;;  %v1183_v49 = vsel %vm558_vm0, %v1182_v46, 0.0  ;;  %v45_v43 = vld [vmem:[%s2059_s3 + $0x18] sm:$0xff]  ;;  %v44_v46 = vld [vmem:[%s2059_s3 + $0x10] sm:$0xff] }
 0x5f6   :  { %1184 = vadd.xlane.f32.xlu1 %v1183_v49  ;;  %v43_v49 = vld [vmem:[%s2059_s3 + $0x8] sm:$0xff]  ;;  %v1917_v18 = vrot.slane %v1621_v4, %v591_v45 }
 0x5f7   :  { %v567_v52 = vmul.f32 %v1854_v47, %v1854_v47 }
 0x5f9   :  { %v569_v57 = vsel %vm65_vm1, %v567_v52, 0.0  ;;  %v1911_v52 = vrot.slane %v1621_v4, %v585_v40 }
 0x5fa   :  { %570 = vadd.xlane.f32.xlu1 %v569_v57  ;;  %v42_v57 = vld [vmem:[%s2059_s3] sm:$0xff] }
 0x66f   :  { %v772_v59 = vpop.xlane.xlu0 %771 }
 0x670   :  { %v773_v60 = vmul.f32 0.03125, %v772_v59 }
 0x672   :  { %v774_v61 = vadd.f32 1e-06, %v773_v60 }
 0x674   :  { %1555 = vrsqrt.f32 %v774_v61 }
 0x67d   :  { %v994_v62 = vpop.xlane.xlu0 %993 }
 0x67e   :  { %v998_v63 = vmul.f32 0.03125, %v994_v62 }
 0x67f   :  { %v1185_v0 = vpop.xlane.xlu1 %1184 }
 0x680   :  { %v1000_v55 = vadd.f32 1e-06, %v998_v63  ;;  %v1186_v32 = vmul.f32 0.03125, %v1185_v0 }
 0x681   :  { %v1556_v8 = vpop.eup %1555 }
 0x682   :  { %1557 = vrsqrt.f32 %v1000_v55  ;;  %v1187_v10 = vadd.f32 1e-06, %v1186_v32  ;;  %v776_v13 = vmul.f32 %v1556_v8, %v768_v16  ;;  %v50_v16 = vld [vmem:[%s2059_s3 + $0x40] sm:$0xff] }
 0x683   :  { %v571_v12 = vpop.xlane.xlu1 %570  ;;  %1291 = vmatpush1.msra.mxu1 %v50_v16 }
 0x684   :  { %1559 = vrsqrt.f32 %v1187_v10  ;;  %v575_v15 = vmul.f32 0.03125, %v571_v12  ;;  %v779_v17 = vmul.f32 %v777_v5, %v776_v13  ;;  %1292 = vmatprep.subr.mxu1 %v49_v19 }
 0x685   :  { %1293 = vmatpush1.msra.mxu1 %v48_v24 }
 0x686   :  { %v577_v21 = vadd.f32 1e-06, %v575_v15  ;;  %v782_v22 = vadd.f32 %v780_v34, %v779_v17  ;;  %1294 = vmatprep.subr.mxu1 %v47_v31 }
 0x687   :  { %1295 = vmatpush1.msra.mxu1 %v46_v38 }
 0x688   :  { %1561 = vrsqrt.f32 %v577_v21  ;;  %785 = vrot.lane.b32.xlu0 %v782_v22, %s1567_s11  ;;  %1296 = vmatprep.subr.mxu1 %v45_v43 }
 0x689   :  { %1297 = vmatpush1.msra.mxu1 %v44_v46 }
 0x68a   :  { %1298 = vmatprep.subr.mxu1 %v43_v49 }
 0x68b   :  { %1299 = vmatpush1.msra.mxu1 %v42_v57 }
 0x68f   :  { %v1558_v59 = vpop.eup %1557 }
 0x690   :  { %v1004_v60 = vmul.f32 %v1558_v59, %v1845_v25 }
 0x691   :  { %v1560_v61 = vpop.eup %1559 }
 0x692   :  { %v1006_v62 = vmul.f32 %v1004_v60, %v1911_v52  ;;  %v1189_v63 = vmul.f32 %v1560_v61, %v1847_v35 }
 0x694   :  { %v1008_v0 = vadd.f32 %v1006_v62, %v1917_v18  ;;  %v1190_v1 = vmul.f32 %v1189_v63, %v777_v5  ;;  %v559_v5 = vsel %vm558_vm0, %v1836_v30, 0.0 }
 0x695   :  { %v1562_v54 = vpop.eup %1561 }
 0x696   :  { %v581_v2 = vmul.f32 %v1562_v54, %v1854_v47  ;;  %v1191_v55 = vadd.f32 %v1190_v1, %v780_v34  ;;  %v1010_v32 = vsel %vm65_vm1, %v1008_v0, 0.0  ;;  %v983_v47 = vsel %vm558_vm0, %v1839_v33, 0.0 }
 0x697   :  { %1376 = vst [vmem:[%s2060_s4 + $0x30] sm:$0xff] %v1010_v32  ;;  %v1011_v8 = vrot.slane %v1010_v32, 4 }
 0x698   :  { %v587_v4 = vmul.f32 %v1911_v52, %v581_v2  ;;  %1194 = vrot.lane.b32.xlu1 %v1191_v55, %s1567_s11  ;;  %s1573_s11 = smov 10  }
 0x699   :  { %v1012_v10 = vadd.f32 %v1011_v8, %v1010_v32 }
 0x69a   :  { %v593_v25 = vadd.f32 %v1917_v18, %v587_v4 }
 0x69b   :  { %v1013_v34 = vrot.slane %v1012_v10, 2 }
 0x69c   :  { %v595_v35 = vsel %vm65_vm1, %v593_v25, 0.0 }
 0x69d   :  { %838 = vst [vmem:[%s2060_s4 + $0x10] sm:$0xff] %v595_v35  ;;  %v596_v9 = vrot.slane %v595_v35, 4  ;;  %v1014_v12 = vadd.f32 %v1013_v34, %v1012_v10 }
 0x69f   :  { %v597_v13 = vadd.f32 %v596_v9, %v595_v35 }
 0x6a1   :  { %v598_v11 = vrot.slane %v597_v13, 2 }
 0x6a3   :  { %v599_v14 = vadd.f32 %v598_v11, %v597_v13 }
 0x6a5   :  { %v600_v15 = vrot.slane %v599_v14, 1 }
 0x6a7   :  { %984 = vadd.xlane.f32.xlu0 %v983_v47  ;;  %v601_v16 = vadd.f32 %v600_v15, %v599_v14 }
 0x6a9   :  { %v603_v21 = vmul.f32 0.125, %v601_v16 }
 0x6ab   :  { %v783_v31 = vsel %vm65_vm1, %v603_v21, 0.0  ;;  %v605_v21 = vrot.slane %v1707_v48, 4 }
 0x6bc   :  { %560 = vadd.xlane.f32.xlu1 %v559_v5 }
 0x6cd   :  { %791 = vrot.lane.b32.xlu1 %v1730_v23, %s1572_s24  ;;  %v1015_v23 = vrot.slane %v1014_v12, 1 }
 0x6cf   :  { %v1016_v17 = vadd.f32 %v1015_v23, %v1014_v12 }
 0x6d1   :  { %1514 = vrot.lane.b32.xlu1 %v1513_v42, %s1573_s11  ;;  %v1017_v19 = vmul.f32 0.125, %v1016_v17 }
 0x6d3   :  { %v1192_v41 = vsel %vm65_vm1, %v1017_v19, 0.0 }
 0x6d4   :  { %v1248_v38 = vrot.slane %v1192_v41, 6 }
 0x6d5   :  { %807 = vrot.lane.b32.xlu1 %v426_v6, %s1574_s25 }
 0x6fa   :  { %v786_v42 = vpop.permute.xlu0 %785 }
 0x6fb   :  { %v788_v22 = vsel %vm65_vm1, 0.0, %v786_v42 }
 0x6fc   :  { %v1245_v24 = vrot.slane %v788_v22, 7 }
 0x6fe   :  { %v1253_v40 = vsel %vm832_vm4, %v783_v31, %v1245_v24 }
 0x6ff   :  { %v1254_v43 = vsel %vm834_vm5, %v1253_v40, %v1248_v38  ;;  %v606_v38 = vmax.f32 %v1707_v48, %v605_v21 }
 0x70a   :  { %v1195_v45 = vpop.permute.xlu1 %1194 }
 0x70b   :  { %v1197_v46 = vsel %vm65_vm1, 0.0, %v1195_v45 }
 0x70c   :  { %v1251_v49 = vrot.slane %v1197_v46, 5 }
 0x70e   :  { %v1256_v57 = vsel %vm1255_vm6, %v1254_v43, %v1251_v49  ;;  %v814_v49 = vsel %vm473_vm14, %v1797_v7, %v1747_v36 }
 0x70f   :  { %1378 = vmatmul.mubr.msk.f32.vlgmr.msra.gmra.mxu1 %vm319_vm2, %v1256_v57  ;;  %vm818_vm2 = vcmask 146432  }
 0x730   :  { %v985_v59 = vpop.xlane.xlu0 %984 }
 0x731   :  { %v987_v60 = vmul.f32 0.03125, %v985_v59 }
 0x733   :  { %v989_v61 = vsub.f32 %v1839_v33, %v987_v60  ;;  %v813_v33 = vsel %vm473_vm14, %v1793_v3, %v1755_v39  ;;  %v427_v39 = vsub.f32 1.0, %v1752_v37  ;;  %v852_v3 = vsub.f32 1.0, %v1774_v51  ;;  %v59_v51 = vld [vmem:[%s2059_s3 + $0x88] sm:$0x3] }
 0x734   :  { %v1019_v37 = vrot.slane %v1711_v53, 4  ;;  %v1260_v34 = vrot.slane %v59_v51, 6 }
 0x735   :  { %v991_v62 = vmul.f32 %v989_v61, %v989_v61 }
 0x737   :  { %v995_v63 = vsel %vm558_vm0, %v991_v62, 0.0 }
 0x738   :  { %996 = vadd.xlane.f32.xlu1 %v995_v63 }
 0x745   :  { %v561_v0 = vpop.xlane.xlu1 %560 }
 0x746   :  { %v564_v1 = vmul.f32 0.03125, %v561_v0 }
 0x748   :  { %v1957_v54 = vsub.f32 %v1836_v30, %v564_v1 }
 0x749   :  { %v792_v2 = vpop.permute.xlu1 %791 }
 0x74a   :  { %v568_v55 = vmul.f32 %v1957_v54, %v1957_v54  ;;  %v816_v30 = vsel %vm815_vm7, %v813_v33, %v792_v2 }
 0x74c   :  { %v572_v32 = vsel %vm558_vm0, %v568_v55, 0.0 }
 0x74d   :  { %573 = vadd.xlane.f32.xlu0 %v572_v32  ;;  %v1962_v4 = vpop.permute.xlu1 %1514 }
 0x74e   :  { %v1516_v25 = vunpack.i.l.bf16 %v1962_v4  ;;  %v1517_v57 = vunpack.i.h.bf16 %v1962_v4 }
 0x750   :  { %v819_v35 = vsel %vm818_vm2, %v816_v30, %v1516_v25 }
 0x751   :  { %v808_v47 = vpop.permute.xlu1 %807 }
 0x752   :  { %v822_v5 = vsel %vm821_vm8, %v819_v35, %v808_v47 }
 0x753   :  { %v825_v6 = vsel %vm824_vm9, %v822_v5, 0.0  ;;  %v1222_v5 = vsel %vm473_vm14, %v1809_v28, %v1765_v44  ;;  %v1223_v44 = vsel %vm473_vm14, %v1805_v27, %v1771_v50 }
 0x754   :  { %836 = vst [vmem:[%s2060_s4] sm:$0xff] %v825_v6 }
 0x763   :  { %793 = vrot.lane.b32.xlu0 %v1727_v20, %s1572_s24  ;;  %v853_v20 = vsub.f32 1.0, %v1779_v56 }
 0x767   :  { %809 = vrot.lane.b32.xlu0 %v427_v39, %s1574_s25 }
 0x76b   :  { %1200 = vrot.lane.b32.xlu0 %v1733_v26, %s1572_s24  ;;  %v1020_v26 = vmax.f32 %v1711_v53, %v1019_v37  ;;  %v1264_v53 = vsel %vm834_vm5, %v59_v51, %v1260_v34 }
 0x76d   :  { %v1021_v10 = vrot.slane %v1020_v26, 2 }
 0x76f   :  { %1202 = vrot.lane.b32.xlu0 %v1736_v29, %s1572_s24  ;;  %v1022_v56 = vmax.f32 %v1020_v26, %v1021_v10 }
 0x771   :  { %v1023_v11 = vrot.slane %v1022_v56, 1 }
 0x773   :  { %1519 = vrot.lane.b32.xlu0 %v1518_v58, %s1573_s11  ;;  %v58_v58 = vld [vmem:[%s2059_s3 + $0x80] sm:$0x3]  ;;  %v1024_v15 = vmax.f32 %v1022_v56, %v1023_v11 }
 0x774   :  { %v1259_v13 = vrot.slane %v58_v58, 6 }
 0x775   :  { %v1233_v22 = vsel %vm274_vm3, %v1024_v15, 0.0 }
 0x776   :  { %v1263_v12 = vsel %vm834_vm5, %v58_v58, %v1259_v13  ;;  %v1235_v45 = vrot.slane %v1233_v22, 7 }
 0x777   :  { %1216 = vrot.lane.b32.xlu0 %v852_v3, %s1574_s25 }
 0x77b   :  { %1218 = vrot.lane.b32.xlu0 %v853_v20, %s1574_s25 }
 0x7c1   :  { %v997_v8 = vpop.xlane.xlu1 %996 }
 0x7c2   :  { %v999_v9 = vmul.f32 0.03125, %v997_v8 }
 0x7c4   :  { %v1001_v29 = vadd.f32 1e-06, %v999_v9 }
 0x7c6   :  { %1563 = vrsqrt.f32 %v1001_v29 }
 0x7cf   :  { %v1334_v14 = vpop.f32.mrf.mxu1 }
 0x7d0   :  { %v1335_v17 = vadd.f32 %v1334_v14, %v1263_v12 }
 0x7d1   :  { %v1336_v23 = vpop.f32.mrf.mxu1 }
 0x7d2   :  { %v1337_v16 = vadd.f32 %v1336_v23, %v1264_v53 }
 0x7d3   :  { %v1564_v19 = vpop.eup %1563 }
 0x7d4   :  { %v1005_v42 = vmul.f32 %v1564_v19, %v989_v61  ;;  %v1341_v41 = vcombine.low %v1335_v17, %v1337_v16  ;;  %v607_v61 = vrot.slane %v606_v38, 2 }
 0x7d6   :  { %v1007_v24 = vmul.f32 %v1005_v42, %v1911_v52  ;;  %1343 = vst [vmem:[%s2061_s5] sm:$0xff] %v1341_v41  ;;  %v574_v31 = vpop.xlane.xlu0 %573  ;;  %v608_v7 = vmax.f32 %v606_v38, %v607_v61 }
 0x7d7   :  { %v576_v40 = vmul.f32 0.03125, %v574_v31 }
 0x7d8   :  { %v1009_v43 = vadd.f32 %v1007_v24, %v1917_v18  ;;  %v609_v32 = vrot.slane %v608_v7, 1 }
 0x7d9   :  { %v578_v46 = vadd.f32 1e-06, %v576_v40 }
 0x7da   :  { %v1232_v59 = vsel %vm65_vm1, %v1009_v43, 0.0  ;;  %v794_v60 = vpop.permute.xlu0 %793  ;;  %v610_v33 = vmax.f32 %v608_v7, %v609_v32 }
 0x7db   :  { %v1237_v62 = vsel %vm832_vm4, %v1232_v59, %v1235_v45  ;;  %1565 = vrsqrt.f32 %v578_v46  ;;  %v817_v48 = vsel %vm815_vm7, %v814_v49, %v794_v60 }
 0x7dc   :  { %v1238_v63 = vsel %vm834_vm5, %v1237_v62, 0.0  ;;  %v820_v0 = vsel %vm818_vm2, %v817_v48, %v1517_v57  ;;  %v828_v47 = vsel %vm274_vm3, %v610_v33, 0.0 }
 0x7dd   :  { %1377 = vst [vmem:[%s2060_s4 + $0x38] sm:$0xff] %v1238_v63  ;;  %v830_v8 = vrot.slane %v828_v47, 7 }
 0x7de   :  { %v810_v36 = vpop.permute.xlu0 %809 }
 0x7df   :  { %v823_v1 = vsel %vm821_vm8, %v820_v0, %v810_v36 }
 0x7e0   :  { %v826_v2 = vsel %vm824_vm9, %v823_v1, 0.0 }
 0x7e1   :  { %837 = vst [vmem:[%s2060_s4 + $0x8] sm:$0xff] %v826_v2 }
 0x7e2   :  { %v1201_v55 = vpop.permute.xlu0 %1200 }
 0x7e3   :  { %v1224_v3 = vsel %vm815_vm7, %v1222_v5, %v1201_v55 }
 0x7e6   :  { %v1203_v4 = vpop.permute.xlu0 %1202 }
 0x7e8   :  { %v1566_v25 = vpop.eup %1565 }
 0x7e9   :  { %v582_v30 = vmul.f32 %v1566_v25, %v1957_v54 }
 0x7ea   :  { %v1520_v35 = vpop.permute.xlu0 %1519 }
 0x7eb   :  { %v588_v6 = vmul.f32 %v1911_v52, %v582_v30  ;;  %v1521_v39 = vunpack.i.l.bf16 %v1520_v35  ;;  %v1522_v26 = vunpack.i.h.bf16 %v1520_v35 }
 0x7ed   :  { %v594_v20 = vadd.f32 %v1917_v18, %v588_v6  ;;  %v1226_v37 = vsel %vm818_vm2, %v1224_v3, %v1521_v39  ;;  %v1225_v18 = vsel %vm815_vm7, %v1223_v44, %v1203_v4 }
 0x7ee   :  { %v1217_v9 = vpop.permute.xlu0 %1216  ;;  %v1227_v51 = vsel %vm818_vm2, %v1225_v18, %v1522_v26 }
 0x7ef   :  { %v827_v54 = vsel %vm65_vm1, %v594_v20, 0.0  ;;  %v1228_v29 = vsel %vm821_vm8, %v1226_v37, %v1217_v9 }
 0x7f0   :  { %v833_v28 = vsel %vm832_vm4, %v827_v54, %v830_v8  ;;  %v1230_v52 = vsel %vm824_vm9, %v1228_v29, 0.0 }
 0x7f1   :  { %v835_v10 = vsel %vm834_vm5, %v833_v28, 0.0  ;;  %1374 = vst [vmem:[%s2060_s4 + $0x20] sm:$0xff] %v1230_v52 }
 0x7f2   :  { %839 = vst [vmem:[%s2060_s4 + $0x18] sm:$0xff] %v835_v10  ;;  %v1219_v58 = vpop.permute.xlu0 %1218 }
 0x7f3   :  { %v1229_v50 = vsel %vm821_vm8, %v1227_v51, %v1219_v58 }
 0x7f4   :  { %v1231_v27 = vsel %vm824_vm9, %v1229_v50, 0.0 }
 0x7f5   :  { %1375 = vst [vmem:[%s2060_s4 + $0x28] sm:$0xff] %v1231_v27 }

</bundles_post_ra>
